<compile_context>
chip_gen: v5e
topology: v5e:2x2
jax: 0.10.0
libtpu: 0.0.40
codegen_flags: <defaults>
</compile_context>

<pallas_src>
import functools

import numpy as np
import jax
import jax.numpy as jnp
from jax.experimental import pallas as pl
from jax.experimental.pallas import tpu as pltpu


def _round_up(x, m):
    return ((int(x) + m - 1) // m) * m


def _vmem_limit_bytes():
    """Generation-aware scoped-VMEM limit (headroom below physical capacity)."""
    try:
        cap = int(pltpu.get_tpu_info().vmem_capacity_bytes)
    except Exception:
        cap = 64 * 1024 * 1024      # assume the smallest (v7x) if query fails
    return min(cap * 3 // 4, 100 * 1024 * 1024)


def _select_tiles(nu128, ni128, d128, vmem_limit):
    """(user tile, item tile, feature tile); all multiples of 128.

    Node tiles serve both as dst-row tiles and as contraction tiles.  Targets
    are 512-class node / 1024-class feature tiles (HBM roofline ~ tm*td/(tm+td)),
    shrunk until the double-buffered working set fits the VMEM budget, then
    capped so the parallel output grid has >= 2 tiles (keeps both v7x
    TensorCores busy; harmless on single-core v5e/v6e).
    """
    t_u, t_i, t_d = min(nu128, 512), min(ni128, 512), min(d128, 1024)

    def working_set(tu, ti, td):
        bf, f32 = 2, 4
        a_blk = tu * ti * bf                        # adjacency tile (either hop)
        x_blk = max(tu, ti) * td * bf               # source-feature tile
        io = max(tu, ti) * td * (f32 + bf + f32)    # acc_in + hop + acc_out
        return 2 * (a_blk + x_blk + io)             # double buffering

    budget = max(vmem_limit * 3 // 4, 4 * 1024 * 1024)
    while working_set(t_u, t_i, t_d) > budget:
        if t_d > 128:
            t_d -= 128
        elif max(t_u, t_i) > 128:
            if t_u >= t_i:
                t_u -= 128
            else:
                t_i -= 128
        else:
            break

    if d128 > t_d:
        pass                                    # feature grid already >= 2
    elif d128 >= 256:
        t_d = _round_up(-(-d128 // 2), 128)     # split the feature axis
    else:                                       # split the node (dst-row) axes
        if nu128 >= 256 and t_u >= nu128:
            t_u = _round_up(-(-nu128 // 2), 128)
        if ni128 >= 256 and t_i >= ni128:
            t_i = _round_up(-(-ni128 // 2), 128)
    return t_u, t_i, t_d


# ----------------------------------------------------------------------------
# Host-side block-sparse packing of the weighted adjacency A[dst, src].
# ----------------------------------------------------------------------------
def _build_block_sparse(dst_idx, src_idx, edge_weight, n_dst_pad, n_src_pad,
                        tm, tk, dtype):
    """Pack the nonzero (tm, tk) tiles of A[dst, src] (+= edge_weight).

    Returns:
      blocks    : (n_nonzero_blocks + 1, tm, tk); blocks[0] is the all-zero pad
                  block used for padded contraction steps.
      a_blk_idx : (n_row_tiles, kmax) int32 -> index into `blocks` for
                  contraction step k of dst-row tile i (0 = zero pad block).
      x_blk_idx : (n_row_tiles, kmax) int32 -> which tk-row slab of the source
                  features feeds the MXU at that step.
    """
    dst_idx = np.asarray(dst_idx, np.int64)
    src_idx = np.asarray(src_idx, np.int64)
    edge_weight = np.asarray(edge_weight, np.float32)
    n_bi, n_bk = n_dst_pad // tm, n_src_pad // tk
    n_edges = int(dst_idx.size)

    counts = np.zeros(n_bi, np.int64)
    if n_edges:
        key = (dst_idx // tm) * n_bk + (src_idx // tk)
        order = np.argsort(key, kind="stable")
        uniq, starts = np.unique(key[order], return_index=True)
        np.add.at(counts, uniq // n_bk, 1)
    else:
        order = np.zeros((0,), np.int64)
        uniq = np.zeros((0,), np.int64)
        starts = np.zeros((0,), np.int64)

    kmax = int(max(1, counts.max()))
    n_blocks = int(uniq.size)

    blocks = np.zeros((n_blocks + 1, tm, tk), np.float32)
    a_blk_idx = np.zeros((n_bi, kmax), np.int32)
    x_blk_idx = np.zeros((n_bi, kmax), np.int32)

    ends = np.append(starts, n_edges)[1:]
    slot = np.zeros(n_bi, np.int64)
    # TODO(synk): vectorize this host loop and flatten/chunk the SMEM index
    # tables for graphs with millions of nonzero blocks.
    for b in range(n_blocks):
        code = int(uniq[b])
        rb, cb = code // n_bk, code % n_bk
        sel = order[int(starts[b]):int(ends[b])]
        np.add.at(blocks[b + 1],
                  (dst_idx[sel] - rb * tm, src_idx[sel] - cb * tk),
                  edge_weight[sel])
        s = int(slot[rb]); slot[rb] = s + 1
        a_blk_idx[rb, s] = b + 1
        x_blk_idx[rb, s] = cb

    return (jnp.asarray(blocks, dtype), jnp.asarray(a_blk_idx),
            jnp.asarray(x_blk_idx))


# ----------------------------------------------------------------------------
# Pallas kernels: one propagation hop as a block-sparse SpMM on the MXU, fused
# with the weighted hop-sum update:
#     hop     = A @ X          (only nonzero A blocks are visited)
#     acc_out = acc_in + hop_w * hop
# Grid: (i over dst-row tiles, j over feature tiles, k over nonzero A blocks).
# ----------------------------------------------------------------------------
def _hop_kernel(a_idx_ref, x_idx_ref, a_ref, x_ref, acc_in_ref,
                hop_ref, acc_out_ref, *, hop_w):
    del a_idx_ref, x_idx_ref        # only consumed by the index_maps

    @pl.when(pl.program_id(2) == 0)
    def _():
        acc_out_ref[...] = jnp.zeros_like(acc_out_ref)

    # bf16 x bf16 -> f32 single-pass MXU matmul, accumulated directly into the
    # f32 output block (VMEM-resident across the contraction axis).
    acc_out_ref[...] += jnp.dot(a_ref[0], x_ref[...],
                                preferred_element_type=jnp.float32)

    @pl.when(pl.program_id(2) == pl.num_programs(2) - 1)
    def _():
        hop = acc_out_ref[...]
        hop_ref[...] = hop.astype(hop_ref.dtype)
        acc_out_ref[...] = acc_in_ref[...] + hop_w * hop


def _hop_last_kernel(a_idx_ref, x_idx_ref, a_ref, x_ref, acc_in_ref,
                     acc_out_ref, *, hop_w):
    """Final hop: same, but the (dead) next-hop features are never written."""
    del a_idx_ref, x_idx_ref

    @pl.when(pl.program_id(2) == 0)
    def _():
        acc_out_ref[...] = jnp.zeros_like(acc_out_ref)

    acc_out_ref[...] += jnp.dot(a_ref[0], x_ref[...],
                                preferred_element_type=jnp.float32)

    @pl.when(pl.program_id(2) == pl.num_programs(2) - 1)
    def _():
        acc_out_ref[...] = acc_in_ref[...] + hop_w * acc_out_ref[...]


def _spmm_hop(a_blocks, a_blk_idx, x_blk_idx, x, acc, hop_w, tm, tk, td,
              vmem_limit, *, write_hop):
    m, d = acc.shape
    grid = (m // tm, d // td, a_blk_idx.shape[1])

    a_spec = pl.BlockSpec((1, tm, tk), lambda i, j, k, ai, xi: (ai[i, k], 0, 0))
    x_spec = pl.BlockSpec((tk, td), lambda i, j, k, ai, xi: (xi[i, k], j))
    io_spec = pl.BlockSpec((tm, td), lambda i, j, k, ai, xi: (i, j))

    if write_hop:
        kernel = functools.partial(_hop_kernel, hop_w=float(hop_w))
        out_shape = (jax.ShapeDtypeStruct((m, d), x.dtype),       # next-hop feats
                     jax.ShapeDtypeStruct((m, d), jnp.float32))   # running sum
        out_specs = (io_spec, io_spec)
    else:
        kernel = functools.partial(_hop_last_kernel, hop_w=float(hop_w))
        out_shape = jax.ShapeDtypeStruct((m, d), jnp.float32)
        out_specs = io_spec

    return pl.pallas_call(
        kernel,
        out_shape=out_shape,
        grid_spec=pltpu.PrefetchScalarGridSpec(
            num_scalar_prefetch=2,
            grid=grid,
            in_specs=[a_spec, x_spec, io_spec],
            out_specs=out_specs),
        compiler_params=pltpu.CompilerParams(
            dimension_semantics=("parallel", "parallel", "arbitrary"),
            vmem_limit_bytes=int(vmem_limit)),
    )(a_blk_idx, x_blk_idx, a_blocks, x, acc)


@functools.partial(jax.jit, static_argnames=("weights", "tiles", "vmem_limit"))
def _lgc_prop_padded(usr_xp, itm_xp,
                     a_iu_blocks, a_iu_idx, a_iu_xidx,
                     a_ui_blocks, a_ui_idx, a_ui_xidx,
                     *, weights, tiles, vmem_limit):
    t_u, t_i, t_d = tiles
    acc_u = weights[0] * usr_xp.astype(jnp.float32)
    acc_i = weights[0] * itm_xp.astype(jnp.float32)
    cur_u, cur_i = usr_xp, itm_xp
    n_hops = len(weights) - 1
    for h, w in enumerate(weights[1:]):                 # static unroll over hops
        last = h == n_hops - 1
        # users receive from items, items receive from users (both read the
        # *previous* hop features, matching the torch ordering).
        if last:
            acc_u = _spmm_hop(a_iu_blocks, a_iu_idx, a_iu_xidx, cur_i, acc_u,
                              w, t_u, t_i, t_d, vmem_limit, write_hop=False)
            acc_i = _spmm_hop(a_ui_blocks, a_ui_idx, a_ui_xidx, cur_u, acc_i,
                              w, t_i, t_u, t_d, vmem_limit, write_hop=False)
        else:
            new_u, acc_u = _spmm_hop(a_iu_blocks, a_iu_idx, a_iu_xidx, cur_i,
                                     acc_u, w, t_u, t_i, t_d, vmem_limit,
                                     write_hop=True)
            new_i, acc_i = _spmm_hop(a_ui_blocks, a_ui_idx, a_ui_xidx, cur_u,
                                     acc_i, w, t_i, t_u, t_d, vmem_limit,
                                     write_hop=True)
            cur_u, cur_i = new_u, new_i
    return acc_u, acc_i


def lgc_prop_pallas(usr_x, itm_x, usr_edge_index, usr_edge_weight,
                    itm_edge_index, itm_edge_weight, weights,
                    *, compute_dtype=jnp.bfloat16):
    """LGCProp forward.  usr_edge_index: row0=user src, row1=item dst;
    itm_edge_index: row0=item src, row1=user dst.  Operands run in bf16 on the
    MXU (f32 accumulation); pass compute_dtype=jnp.float32 to trade speed for
    tighter numerics."""
    usr_x = jnp.asarray(usr_x, jnp.float32)
    itm_x = jnp.asarray(itm_x, jnp.float32)
    n_u, d = usr_x.shape
    n_i, d2 = itm_x.shape
    assert d == d2

    weights = tuple(float(w) for w in weights)
    if len(weights) == 1:
        return weights[0] * usr_x, weights[0] * itm_x

    usr_si = np.asarray(usr_edge_index[0], np.int64)
    usr_di = np.asarray(usr_edge_index[1], np.int64)
    itm_si = np.asarray(itm_edge_index[0], np.int64)
    itm_di = np.asarray(itm_edge_index[1], np.int64)
    # Host-side bounds validation (no runtime OOB checks on TPU VMEM refs).
    if usr_si.size:
        assert usr_si.min() >= 0 and usr_si.max() < n_u
        assert usr_di.min() >= 0 and usr_di.max() < n_i
    if itm_si.size:
        assert itm_si.min() >= 0 and itm_si.max() < n_i
        assert itm_di.min() >= 0 and itm_di.max() < n_u

    vmem_limit = _vmem_limit_bytes()
    t_u, t_i, t_d = _select_tiles(_round_up(n_u, 128), _round_up(n_i, 128),
                                  _round_up(d, 128), vmem_limit)
    n_u_pad = _round_up(n_u, t_u)
    n_i_pad = _round_up(n_i, t_i)
    d_pad = _round_up(d, t_d)

    # Block-sparse weighted adjacencies (only nonzero tiles are materialized):
    #   a_iu[user, item] : users receive messages from items (itm_edge_index)
    #   a_ui[item, user] : items receive messages from users (usr_edge_index)
    a_iu_blocks, a_iu_idx, a_iu_xidx = _build_block_sparse(
        itm_di, itm_si, itm_edge_weight, n_u_pad, n_i_pad, t_u, t_i,
        compute_dtype)
    a_ui_blocks, a_ui_idx, a_ui_xidx = _build_block_sparse(
        usr_di, usr_si, usr_edge_weight, n_i_pad, n_u_pad, t_i, t_u,
        compute_dtype)

    usr_xp = jnp.zeros((n_u_pad, d_pad), jnp.float32).at[:n_u, :d].set(usr_x)
    itm_xp = jnp.zeros((n_i_pad, d_pad), jnp.float32).at[:n_i, :d].set(itm_x)

    acc_u, acc_i = _lgc_prop_padded(
        usr_xp.astype(compute_dtype), itm_xp.astype(compute_dtype),
        a_iu_blocks, a_iu_idx, a_iu_xidx,
        a_ui_blocks, a_ui_idx, a_ui_xidx,
        weights=weights, tiles=(t_u, t_i, t_d), vmem_limit=vmem_limit)

    return acc_u[:n_u, :d], acc_i[:n_i, :d]


# ----------------------------------------------------------------------------
# Host-side glue mirroring the external `utils.*` helpers (index preprocessing).
# ----------------------------------------------------------------------------
def make_undirected(src_edge_index, dst_edge_index):
    # TODO(synk): exact `utils.make_undirected` semantics are external; assumed
    # "union of src-oriented edges with flipped dst-oriented edges (coalesced)".
    flipped = dst_edge_index[::-1, :]
    both = np.concatenate([src_edge_index, flipped], axis=1)
    return np.unique(both, axis=1).astype(np.int32)


def make_weight(edge_index, num_src, num_dst):
    # TODO(synk): exact `utils.make_weight` semantics are external; using the
    # standard LightGCN symmetric normalization 1/sqrt(deg_src * deg_dst).
    src, dst = edge_index
    deg_src = np.bincount(src, minlength=num_src).astype(np.float32)
    deg_dst = np.bincount(dst, minlength=num_dst).astype(np.float32)
    w = 1.0 / np.sqrt(np.maximum(deg_src[src], 1.0) * np.maximum(deg_dst[dst], 1.0))
    return w.astype(np.float32)


# ----------------------------------------------------------------------------
# Pure-JAX reference (LGConv via segment_sum) for correctness checking.
# ----------------------------------------------------------------------------
def _lgconv_ref(src_x, n_dst, edge_index, edge_weight):
    src, dst = jnp.asarray(edge_index[0]), jnp.asarray(edge_index[1])
    msg = jnp.asarray(edge_weight)[:, None] * src_x[src]
    return jax.ops.segment_sum(msg, dst, num_segments=n_dst)


def lgc_prop_ref(usr_x, itm_x, usr_ei, usr_ew, itm_ei, itm_ew, weights):
    new_u = jnp.zeros_like(usr_x)
    new_i = jnp.zeros_like(itm_x)
    u, it = usr_x, itm_x
    for idx, w in enumerate(weights):
        if idx != 0:
            tmp_u = _lgconv_ref(it, usr_x.shape[0], itm_ei, itm_ew)
            tmp_i = _lgconv_ref(u, itm_x.shape[0], usr_ei, usr_ew)
            u, it = tmp_u, tmp_i
        new_u = new_u + w * u
        new_i = new_i + w * it
    return new_u, new_i


if __name__ == "__main__":
    key = jax.random.PRNGKey(0)
    k1, k2, k3, k4, k5, k6 = jax.random.split(key, 6)

    N_USR, N_ITM, D, E = 192, 256, 64, 1500
    usr_x = jax.random.normal(k1, (N_USR, D), dtype=jnp.float32)
    itm_x = jax.random.normal(k2, (N_ITM, D), dtype=jnp.float32)

    # usr_edge_index: row0 = user (src), row1 = item (dst)
    usr_ei = np.stack([np.asarray(jax.random.randint(k3, (E,), 0, N_USR)),
                       np.asarray(jax.random.randint(k4, (E,), 0, N_ITM))]).astype(np.int32)
    # itm_edge_index: row0 = item (src), row1 = user (dst)
    itm_ei = np.stack([np.asarray(jax.random.randint(k5, (E,), 0, N_ITM)),
                       np.asarray(jax.random.randint(k6, (E,), 0, N_USR))]).astype(np.int32)

    # LGCProp(weights=2) -> [1/3, 1/3, 1/3], undirected=True
    K = 2
    weights = [1.0 / (K + 1)] * (K + 1)

    # undirected=True branch of LGCProp.forward (second make_undirected call
    # uses the already-updated usr_edge_index, mirroring the torch ordering).
    usr_ei_u = make_undirected(usr_ei, itm_ei)
    itm_ei_u = make_undirected(itm_ei, usr_ei_u)
    usr_ew = make_weight(usr_ei_u, N_USR, N_ITM)
    itm_ew = make_weight(itm_ei_u, N_ITM, N_USR)

    out_u, out_i = lgc_prop_pallas(usr_x, itm_x, usr_ei_u, usr_ew,
                                   itm_ei_u, itm_ew, weights)
    out_u, out_i = jax.block_until_ready((out_u, out_i))

    ref_u, ref_i = lgc_prop_ref(usr_x, itm_x, usr_ei_u, usr_ew,
                                itm_ei_u, itm_ew, weights)
    ref_u, ref_i = jax.block_until_ready((ref_u, ref_i))

    # Tolerance reflects bf16 operand / hop quantization (accumulation is f32).
    err_u = np.max(np.abs(np.asarray(out_u) - np.asarray(ref_u)))
    err_i = np.max(np.abs(np.asarray(out_i) - np.asarray(ref_i)))
    assert np.allclose(np.asarray(out_u), np.asarray(ref_u),
                       rtol=5e-2, atol=5e-2), err_u
    assert np.allclose(np.asarray(out_i), np.asarray(ref_i),
                       rtol=5e-2, atol=5e-2), err_i
    print("KERNEL_OK")
</pallas_src>

<mosaic_0001>
module attributes {stable_mosaic.version = 11 : i64} {
  func.func @_hop_kernel(%arg0: i32, %arg1: i32, %arg2: i32, %arg3: memref<2x2xi32, #tpu.memory_space<smem>>, %arg4: memref<2x2xi32, #tpu.memory_space<smem>>, %arg5: memref<1x128x128xbf16, #tpu.memory_space<vmem>>, %arg6: memref<128x128xbf16, #tpu.memory_space<vmem>>, %arg7: memref<128x128xf32, #tpu.memory_space<vmem>>, %arg8: memref<128x128xbf16, #tpu.memory_space<vmem>>, %arg9: memref<128x128xf32, #tpu.memory_space<vmem>>) attributes {dimension_semantics = [#tpu.dimension_semantics<parallel>, #tpu.dimension_semantics<parallel>, #tpu.dimension_semantics<arbitrary>], iteration_bounds = array<i64: 2, 1, 2>, scalar_prefetch = 2 : i64, scratch_operands = 0 : i64, tpu.core_type = #tpu.core_type<tc>, window_params = [{transform_indices = @transform_0, window_bounds = array<i64: 1, 128, 128>}, {transform_indices = @transform_1, window_bounds = array<i64: 128, 128>}, {transform_indices = @transform_2, window_bounds = array<i64: 128, 128>}, {transform_indices = @transform_3, window_bounds = array<i64: 128, 128>}, {transform_indices = @transform_4, window_bounds = array<i64: 128, 128>}]} {
    %c0_i32 = arith.constant 0 : i32
    %0 = arith.cmpi eq, %arg2, %c0_i32 : i32
    %1 = arith.extui %0 : i1 to i32
    %c0_i32_0 = arith.constant 0 : i32
    %2 = arith.cmpi ne, %1, %c0_i32_0 : i32
    scf.if %2 {
      %cst_10 = arith.constant 0.000000e+00 : f32
      %13 = vector.broadcast %cst_10 : f32 to vector<128x128xf32>
      %c0_11 = arith.constant 0 : index
      %c0_12 = arith.constant 0 : index
      %14 = vector.load %arg9[%c0_11, %c0_12] : memref<128x128xf32, #tpu.memory_space<vmem>>, vector<128x128xf32>
      tpu.vector_store %arg9[%c0_11, %c0_12], %13 {strides = array<i32>} : memref<128x128xf32, #tpu.memory_space<vmem>>, vector<128x128xf32>,
    } else {
    }
    %c0 = arith.constant 0 : index
    %c0_1 = arith.constant 0 : index
    %3 = vector.load %arg9[%c0, %c0_1] : memref<128x128xf32, #tpu.memory_space<vmem>>, vector<128x128xf32>
    %c0_2 = arith.constant 0 : index
    %c0_3 = arith.constant 0 : index
    %c0_4 = arith.constant 0 : index
    %4 = vector.load %arg5[%c0_2, %c0_3, %c0_4] : memref<1x128x128xbf16, #tpu.memory_space<vmem>>, vector<1x128x128xbf16>
    %5 = vector.shape_cast %4 : vector<1x128x128xbf16> to vector<128x128xbf16>
    %c0_5 = arith.constant 0 : index
    %c0_6 = arith.constant 0 : index
    %6 = vector.load %arg6[%c0_5, %c0_6] : memref<128x128xbf16, #tpu.memory_space<vmem>>, vector<128x128xbf16>
    %cst = arith.constant dense<0.000000e+00> : vector<128x128xf32>
    %7 = tpu.matmul %5, %6, %cst {dimension_numbers = #tpu.dot_dimension_numbers<[1], [0], [0], [1], [0, 0, 1, 1], [], []>} : vector<128x128xbf16>, vector<128x128xbf16>, vector<128x128xf32> -> vector<128x128xf32>
    %8 = arith.addf %3, %7 : vector<128x128xf32>
    %c0_7 = arith.constant 0 : index
    %c0_8 = arith.constant 0 : index
    %9 = vector.load %arg9[%c0_7, %c0_8] : memref<128x128xf32, #tpu.memory_space<vmem>>, vector<128x128xf32>
    tpu.vector_store %arg9[%c0_7, %c0_8], %8 {strides = array<i32>} : memref<128x128xf32, #tpu.memory_space<vmem>>, vector<128x128xf32>,
    %c1_i32 = arith.constant 1 : i32
    %10 = arith.cmpi eq, %arg2, %c1_i32 : i32
    %11 = arith.extui %10 : i1 to i32
    %c0_i32_9 = arith.constant 0 : i32
    %12 = arith.cmpi ne, %11, %c0_i32_9 : i32
    scf.if %12 {
      %c0_10 = arith.constant 0 : index
      %c0_11 = arith.constant 0 : index
      %13 = vector.load %arg9[%c0_10, %c0_11] : memref<128x128xf32, #tpu.memory_space<vmem>>, vector<128x128xf32>
      %14 = arith.truncf %13 : vector<128x128xf32> to vector<128x128xbf16>
      %c0_12 = arith.constant 0 : index
      %c0_13 = arith.constant 0 : index
      %15 = vector.load %arg8[%c0_12, %c0_13] : memref<128x128xbf16, #tpu.memory_space<vmem>>, vector<128x128xbf16>
      tpu.vector_store %arg8[%c0_12, %c0_13], %14 {strides = array<i32>} : memref<128x128xbf16, #tpu.memory_space<vmem>>, vector<128x128xbf16>,
      %c0_14 = arith.constant 0 : index
      %c0_15 = arith.constant 0 : index
      %16 = vector.load %arg7[%c0_14, %c0_15] : memref<128x128xf32, #tpu.memory_space<vmem>>, vector<128x128xf32>
      %cst_16 = arith.constant 0.333333343 : f32
      %17 = vector.broadcast %cst_16 : f32 to vector<128x128xf32>
      %18 = arith.mulf %17, %13 : vector<128x128xf32>
      %19 = arith.addf %16, %18 : vector<128x128xf32>
      %c0_17 = arith.constant 0 : index
      %c0_18 = arith.constant 0 : index
      %20 = vector.load %arg9[%c0_17, %c0_18] : memref<128x128xf32, #tpu.memory_space<vmem>>, vector<128x128xf32>
      tpu.vector_store %arg9[%c0_17, %c0_18], %19 {strides = array<i32>} : memref<128x128xf32, #tpu.memory_space<vmem>>, vector<128x128xf32>,
    } else {
    }
    return
  }
  func.func @transform_0(%arg0: i32, %arg1: i32, %arg2: i32, %arg3: memref<2x2xi32, #tpu.memory_space<smem>>, %arg4: memref<2x2xi32, #tpu.memory_space<smem>>) -> (i32, i32, i32) {
    %0 = arith.index_cast %arg0 : i32 to index
    %1 = arith.index_cast %arg2 : i32 to index
    %2 = memref.load %arg3[%0, %1] : memref<2x2xi32, #tpu.memory_space<smem>>
    %c0_i32 = arith.constant 0 : i32
    %c0_i32_0 = arith.constant 0 : i32
    %c0_i32_1 = arith.constant 0 : i32
    return %2, %c0_i32, %c0_i32_0 : i32, i32, i32
  }
  func.func @transform_1(%arg0: i32, %arg1: i32, %arg2: i32, %arg3: memref<2x2xi32, #tpu.memory_space<smem>>, %arg4: memref<2x2xi32, #tpu.memory_space<smem>>) -> (i32, i32) {
    %0 = arith.index_cast %arg0 : i32 to index
    %1 = arith.index_cast %arg2 : i32 to index
    %2 = memref.load %arg4[%0, %1] : memref<2x2xi32, #tpu.memory_space<smem>>
    %c0_i32 = arith.constant 0 : i32
    return %2, %arg1 : i32, i32
  }
  func.func @transform_2(%arg0: i32, %arg1: i32, %arg2: i32, %arg3: memref<2x2xi32, #tpu.memory_space<smem>>, %arg4: memref<2x2xi32, #tpu.memory_space<smem>>) -> (i32, i32) {
    %c0_i32 = arith.constant 0 : i32
    return %arg0, %arg1 : i32, i32
  }
  func.func @transform_3(%arg0: i32, %arg1: i32, %arg2: i32, %arg3: memref<2x2xi32, #tpu.memory_space<smem>>, %arg4: memref<2x2xi32, #tpu.memory_space<smem>>) -> (i32, i32) {
    %c0_i32 = arith.constant 0 : i32
    return %arg0, %arg1 : i32, i32
  }
  func.func @transform_4(%arg0: i32, %arg1: i32, %arg2: i32, %arg3: memref<2x2xi32, #tpu.memory_space<smem>>, %arg4: memref<2x2xi32, #tpu.memory_space<smem>>) -> (i32, i32) {
    %c0_i32 = arith.constant 0 : i32
    return %arg0, %arg1 : i32, i32
  }
}

module attributes {stable_mosaic.version = 11 : i64} {
  func.func @_hop_kernel(%arg0: i32, %arg1: i32, %arg2: i32, %arg3: memref<2x2xi32, #tpu.memory_space<smem>>, %arg4: memref<2x2xi32, #tpu.memory_space<smem>>, %arg5: memref<1x128x128xbf16, #tpu.memory_space<vmem>>, %arg6: memref<128x128xbf16, #tpu.memory_space<vmem>>, %arg7: memref<128x128xf32, #tpu.memory_space<vmem>>, %arg8: memref<128x128xbf16, #tpu.memory_space<vmem>>, %arg9: memref<128x128xf32, #tpu.memory_space<vmem>>) attributes {dimension_semantics = [#tpu.dimension_semantics<parallel>, #tpu.dimension_semantics<parallel>, #tpu.dimension_semantics<arbitrary>], iteration_bounds = array<i64: 2, 1, 2>, scalar_prefetch = 2 : i64, scratch_operands = 0 : i64, tpu.core_type = #tpu.core_type<tc>, window_params = [{transform_indices = @transform_0, window_bounds = array<i64: 1, 128, 128>}, {transform_indices = @transform_1, window_bounds = array<i64: 128, 128>}, {transform_indices = @transform_2, window_bounds = array<i64: 128, 128>}, {transform_indices = @transform_3, window_bounds = array<i64: 128, 128>}, {transform_indices = @transform_4, window_bounds = array<i64: 128, 128>}]} {
    %c0_i32 = arith.constant 0 : i32
    %0 = arith.cmpi eq, %arg2, %c0_i32 : i32
    %1 = arith.extui %0 : i1 to i32
    %c0_i32_0 = arith.constant 0 : i32
    %2 = arith.cmpi ne, %1, %c0_i32_0 : i32
    scf.if %2 {
      %cst_10 = arith.constant 0.000000e+00 : f32
      %13 = vector.broadcast %cst_10 : f32 to vector<128x128xf32>
      %c0_11 = arith.constant 0 : index
      %c0_12 = arith.constant 0 : index
      %14 = vector.load %arg9[%c0_11, %c0_12] : memref<128x128xf32, #tpu.memory_space<vmem>>, vector<128x128xf32>
      tpu.vector_store %arg9[%c0_11, %c0_12], %13 {strides = array<i32>} : memref<128x128xf32, #tpu.memory_space<vmem>>, vector<128x128xf32>,
    } else {
    }
    %c0 = arith.constant 0 : index
    %c0_1 = arith.constant 0 : index
    %3 = vector.load %arg9[%c0, %c0_1] : memref<128x128xf32, #tpu.memory_space<vmem>>, vector<128x128xf32>
    %c0_2 = arith.constant 0 : index
    %c0_3 = arith.constant 0 : index
    %c0_4 = arith.constant 0 : index
    %4 = vector.load %arg5[%c0_2, %c0_3, %c0_4] : memref<1x128x128xbf16, #tpu.memory_space<vmem>>, vector<1x128x128xbf16>
    %5 = vector.shape_cast %4 : vector<1x128x128xbf16> to vector<128x128xbf16>
    %c0_5 = arith.constant 0 : index
    %c0_6 = arith.constant 0 : index
    %6 = vector.load %arg6[%c0_5, %c0_6] : memref<128x128xbf16, #tpu.memory_space<vmem>>, vector<128x128xbf16>
    %cst = arith.constant dense<0.000000e+00> : vector<128x128xf32>
    %7 = tpu.matmul %5, %6, %cst {dimension_numbers = #tpu.dot_dimension_numbers<[1], [0], [0], [1], [0, 0, 1, 1], [], []>} : vector<128x128xbf16>, vector<128x128xbf16>, vector<128x128xf32> -> vector<128x128xf32>
    %8 = arith.addf %3, %7 : vector<128x128xf32>
    %c0_7 = arith.constant 0 : index
    %c0_8 = arith.constant 0 : index
    %9 = vector.load %arg9[%c0_7, %c0_8] : memref<128x128xf32, #tpu.memory_space<vmem>>, vector<128x128xf32>
    tpu.vector_store %arg9[%c0_7, %c0_8], %8 {strides = array<i32>} : memref<128x128xf32, #tpu.memory_space<vmem>>, vector<128x128xf32>,
    %c1_i32 = arith.constant 1 : i32
    %10 = arith.cmpi eq, %arg2, %c1_i32 : i32
    %11 = arith.extui %10 : i1 to i32
    %c0_i32_9 = arith.constant 0 : i32
    %12 = arith.cmpi ne, %11, %c0_i32_9 : i32
    scf.if %12 {
      %c0_10 = arith.constant 0 : index
      %c0_11 = arith.constant 0 : index
      %13 = vector.load %arg9[%c0_10, %c0_11] : memref<128x128xf32, #tpu.memory_space<vmem>>, vector<128x128xf32>
      %14 = arith.truncf %13 : vector<128x128xf32> to vector<128x128xbf16>
      %c0_12 = arith.constant 0 : index
      %c0_13 = arith.constant 0 : index
      %15 = vector.load %arg8[%c0_12, %c0_13] : memref<128x128xbf16, #tpu.memory_space<vmem>>, vector<128x128xbf16>
      tpu.vector_store %arg8[%c0_12, %c0_13], %14 {strides = array<i32>} : memref<128x128xbf16, #tpu.memory_space<vmem>>, vector<128x128xbf16>,
      %c0_14 = arith.constant 0 : index
      %c0_15 = arith.constant 0 : index
      %16 = vector.load %arg7[%c0_14, %c0_15] : memref<128x128xf32, #tpu.memory_space<vmem>>, vector<128x128xf32>
      %cst_16 = arith.constant 0.333333343 : f32
      %17 = vector.broadcast %cst_16 : f32 to vector<128x128xf32>
      %18 = arith.mulf %17, %13 : vector<128x128xf32>
      %19 = arith.addf %16, %18 : vector<128x128xf32>
      %c0_17 = arith.constant 0 : index
      %c0_18 = arith.constant 0 : index
      %20 = vector.load %arg9[%c0_17, %c0_18] : memref<128x128xf32, #tpu.memory_space<vmem>>, vector<128x128xf32>
      tpu.vector_store %arg9[%c0_17, %c0_18], %19 {strides = array<i32>} : memref<128x128xf32, #tpu.memory_space<vmem>>, vector<128x128xf32>,
    } else {
    }
    return
  }
  func.func @transform_0(%arg0: i32, %arg1: i32, %arg2: i32, %arg3: memref<2x2xi32, #tpu.memory_space<smem>>, %arg4: memref<2x2xi32, #tpu.memory_space<smem>>) -> (i32, i32, i32) {
    %0 = arith.index_cast %arg0 : i32 to index
    %1 = arith.index_cast %arg2 : i32 to index
    %2 = memref.load %arg3[%0, %1] : memref<2x2xi32, #tpu.memory_space<smem>>
    %c0_i32 = arith.constant 0 : i32
    %c0_i32_0 = arith.constant 0 : i32
    %c0_i32_1 = arith.constant 0 : i32
    return %2, %c0_i32, %c0_i32_0 : i32, i32, i32
  }
  func.func @transform_1(%arg0: i32, %arg1: i32, %arg2: i32, %arg3: memref<2x2xi32, #tpu.memory_space<smem>>, %arg4: memref<2x2xi32, #tpu.memory_space<smem>>) -> (i32, i32) {
    %0 = arith.index_cast %arg0 : i32 to index
    %1 = arith.index_cast %arg2 : i32 to index
    %2 = memref.load %arg4[%0, %1] : memref<2x2xi32, #tpu.memory_space<smem>>
    %c0_i32 = arith.constant 0 : i32
    return %2, %arg1 : i32, i32
  }
  func.func @transform_2(%arg0: i32, %arg1: i32, %arg2: i32, %arg3: memref<2x2xi32, #tpu.memory_space<smem>>, %arg4: memref<2x2xi32, #tpu.memory_space<smem>>) -> (i32, i32) {
    %c0_i32 = arith.constant 0 : i32
    return %arg0, %arg1 : i32, i32
  }
  func.func @transform_3(%arg0: i32, %arg1: i32, %arg2: i32, %arg3: memref<2x2xi32, #tpu.memory_space<smem>>, %arg4: memref<2x2xi32, #tpu.memory_space<smem>>) -> (i32, i32) {
    %c0_i32 = arith.constant 0 : i32
    return %arg0, %arg1 : i32, i32
  }
  func.func @transform_4(%arg0: i32, %arg1: i32, %arg2: i32, %arg3: memref<2x2xi32, #tpu.memory_space<smem>>, %arg4: memref<2x2xi32, #tpu.memory_space<smem>>) -> (i32, i32) {
    %c0_i32 = arith.constant 0 : i32
    return %arg0, %arg1 : i32, i32
  }
}

module attributes {stable_mosaic.version = 11 : i64} {
  func.func @_hop_last_kernel(%arg0: i32, %arg1: i32, %arg2: i32, %arg3: memref<2x2xi32, #tpu.memory_space<smem>>, %arg4: memref<2x2xi32, #tpu.memory_space<smem>>, %arg5: memref<1x128x128xbf16, #tpu.memory_space<vmem>>, %arg6: memref<128x128xbf16, #tpu.memory_space<vmem>>, %arg7: memref<128x128xf32, #tpu.memory_space<vmem>>, %arg8: memref<128x128xf32, #tpu.memory_space<vmem>>) attributes {dimension_semantics = [#tpu.dimension_semantics<parallel>, #tpu.dimension_semantics<parallel>, #tpu.dimension_semantics<arbitrary>], iteration_bounds = array<i64: 2, 1, 2>, scalar_prefetch = 2 : i64, scratch_operands = 0 : i64, tpu.core_type = #tpu.core_type<tc>, window_params = [{transform_indices = @transform_0, window_bounds = array<i64: 1, 128, 128>}, {transform_indices = @transform_1, window_bounds = array<i64: 128, 128>}, {transform_indices = @transform_2, window_bounds = array<i64: 128, 128>}, {transform_indices = @transform_3, window_bounds = array<i64: 128, 128>}]} {
    %c0_i32 = arith.constant 0 : i32
    %0 = arith.cmpi eq, %arg2, %c0_i32 : i32
    %1 = arith.extui %0 : i1 to i32
    %c0_i32_0 = arith.constant 0 : i32
    %2 = arith.cmpi ne, %1, %c0_i32_0 : i32
    scf.if %2 {
      %cst_10 = arith.constant 0.000000e+00 : f32
      %13 = vector.broadcast %cst_10 : f32 to vector<128x128xf32>
      %c0_11 = arith.constant 0 : index
      %c0_12 = arith.constant 0 : index
      %14 = vector.load %arg8[%c0_11, %c0_12] : memref<128x128xf32, #tpu.memory_space<vmem>>, vector<128x128xf32>
      tpu.vector_store %arg8[%c0_11, %c0_12], %13 {strides = array<i32>} : memref<128x128xf32, #tpu.memory_space<vmem>>, vector<128x128xf32>,
    } else {
    }
    %c0 = arith.constant 0 : index
    %c0_1 = arith.constant 0 : index
    %3 = vector.load %arg8[%c0, %c0_1] : memref<128x128xf32, #tpu.memory_space<vmem>>, vector<128x128xf32>
    %c0_2 = arith.constant 0 : index
    %c0_3 = arith.constant 0 : index
    %c0_4 = arith.constant 0 : index
    %4 = vector.load %arg5[%c0_2, %c0_3, %c0_4] : memref<1x128x128xbf16, #tpu.memory_space<vmem>>, vector<1x128x128xbf16>
    %5 = vector.shape_cast %4 : vector<1x128x128xbf16> to vector<128x128xbf16>
    %c0_5 = arith.constant 0 : index
    %c0_6 = arith.constant 0 : index
    %6 = vector.load %arg6[%c0_5, %c0_6] : memref<128x128xbf16, #tpu.memory_space<vmem>>, vector<128x128xbf16>
    %cst = arith.constant dense<0.000000e+00> : vector<128x128xf32>
    %7 = tpu.matmul %5, %6, %cst {dimension_numbers = #tpu.dot_dimension_numbers<[1], [0], [0], [1], [0, 0, 1, 1], [], []>} : vector<128x128xbf16>, vector<128x128xbf16>, vector<128x128xf32> -> vector<128x128xf32>
    %8 = arith.addf %3, %7 : vector<128x128xf32>
    %c0_7 = arith.constant 0 : index
    %c0_8 = arith.constant 0 : index
    %9 = vector.load %arg8[%c0_7, %c0_8] : memref<128x128xf32, #tpu.memory_space<vmem>>, vector<128x128xf32>
    tpu.vector_store %arg8[%c0_7, %c0_8], %8 {strides = array<i32>} : memref<128x128xf32, #tpu.memory_space<vmem>>, vector<128x128xf32>,
    %c1_i32 = arith.constant 1 : i32
    %10 = arith.cmpi eq, %arg2, %c1_i32 : i32
    %11 = arith.extui %10 : i1 to i32
    %c0_i32_9 = arith.constant 0 : i32
    %12 = arith.cmpi ne, %11, %c0_i32_9 : i32
    scf.if %12 {
      %c0_10 = arith.constant 0 : index
      %c0_11 = arith.constant 0 : index
      %13 = vector.load %arg7[%c0_10, %c0_11] : memref<128x128xf32, #tpu.memory_space<vmem>>, vector<128x128xf32>
      %c0_12 = arith.constant 0 : index
      %c0_13 = arith.constant 0 : index
      %14 = vector.load %arg8[%c0_12, %c0_13] : memref<128x128xf32, #tpu.memory_space<vmem>>, vector<128x128xf32>
      %cst_14 = arith.constant 0.333333343 : f32
      %15 = vector.broadcast %cst_14 : f32 to vector<128x128xf32>
      %16 = arith.mulf %15, %14 : vector<128x128xf32>
      %17 = arith.addf %13, %16 : vector<128x128xf32>
      %c0_15 = arith.constant 0 : index
      %c0_16 = arith.constant 0 : index
      %18 = vector.load %arg8[%c0_15, %c0_16] : memref<128x128xf32, #tpu.memory_space<vmem>>, vector<128x128xf32>
      tpu.vector_store %arg8[%c0_15, %c0_16], %17 {strides = array<i32>} : memref<128x128xf32, #tpu.memory_space<vmem>>, vector<128x128xf32>,
    } else {
    }
    return
  }
  func.func @transform_0(%arg0: i32, %arg1: i32, %arg2: i32, %arg3: memref<2x2xi32, #tpu.memory_space<smem>>, %arg4: memref<2x2xi32, #tpu.memory_space<smem>>) -> (i32, i32, i32) {
    %0 = arith.index_cast %arg0 : i32 to index
    %1 = arith.index_cast %arg2 : i32 to index
    %2 = memref.load %arg3[%0, %1] : memref<2x2xi32, #tpu.memory_space<smem>>
    %c0_i32 = arith.constant 0 : i32
    %c0_i32_0 = arith.constant 0 : i32
    %c0_i32_1 = arith.constant 0 : i32
    return %2, %c0_i32, %c0_i32_0 : i32, i32, i32
  }
  func.func @transform_1(%arg0: i32, %arg1: i32, %arg2: i32, %arg3: memref<2x2xi32, #tpu.memory_space<smem>>, %arg4: memref<2x2xi32, #tpu.memory_space<smem>>) -> (i32, i32) {
    %0 = arith.index_cast %arg0 : i32 to index
    %1 = arith.index_cast %arg2 : i32 to index
    %2 = memref.load %arg4[%0, %1] : memref<2x2xi32, #tpu.memory_space<smem>>
    %c0_i32 = arith.constant 0 : i32
    return %2, %arg1 : i32, i32
  }
  func.func @transform_2(%arg0: i32, %arg1: i32, %arg2: i32, %arg3: memref<2x2xi32, #tpu.memory_space<smem>>, %arg4: memref<2x2xi32, #tpu.memory_space<smem>>) -> (i32, i32) {
    %c0_i32 = arith.constant 0 : i32
    return %arg0, %arg1 : i32, i32
  }
  func.func @transform_3(%arg0: i32, %arg1: i32, %arg2: i32, %arg3: memref<2x2xi32, #tpu.memory_space<smem>>, %arg4: memref<2x2xi32, #tpu.memory_space<smem>>) -> (i32, i32) {
    %c0_i32 = arith.constant 0 : i32
    return %arg0, %arg1 : i32, i32
  }
}

module attributes {stable_mosaic.version = 11 : i64} {
  func.func @_hop_last_kernel(%arg0: i32, %arg1: i32, %arg2: i32, %arg3: memref<2x2xi32, #tpu.memory_space<smem>>, %arg4: memref<2x2xi32, #tpu.memory_space<smem>>, %arg5: memref<1x128x128xbf16, #tpu.memory_space<vmem>>, %arg6: memref<128x128xbf16, #tpu.memory_space<vmem>>, %arg7: memref<128x128xf32, #tpu.memory_space<vmem>>, %arg8: memref<128x128xf32, #tpu.memory_space<vmem>>) attributes {dimension_semantics = [#tpu.dimension_semantics<parallel>, #tpu.dimension_semantics<parallel>, #tpu.dimension_semantics<arbitrary>], iteration_bounds = array<i64: 2, 1, 2>, scalar_prefetch = 2 : i64, scratch_operands = 0 : i64, tpu.core_type = #tpu.core_type<tc>, window_params = [{transform_indices = @transform_0, window_bounds = array<i64: 1, 128, 128>}, {transform_indices = @transform_1, window_bounds = array<i64: 128, 128>}, {transform_indices = @transform_2, window_bounds = array<i64: 128, 128>}, {transform_indices = @transform_3, window_bounds = array<i64: 128, 128>}]} {
    %c0_i32 = arith.constant 0 : i32
    %0 = arith.cmpi eq, %arg2, %c0_i32 : i32
    %1 = arith.extui %0 : i1 to i32
    %c0_i32_0 = arith.constant 0 : i32
    %2 = arith.cmpi ne, %1, %c0_i32_0 : i32
    scf.if %2 {
      %cst_10 = arith.constant 0.000000e+00 : f32
      %13 = vector.broadcast %cst_10 : f32 to vector<128x128xf32>
      %c0_11 = arith.constant 0 : index
      %c0_12 = arith.constant 0 : index
      %14 = vector.load %arg8[%c0_11, %c0_12] : memref<128x128xf32, #tpu.memory_space<vmem>>, vector<128x128xf32>
      tpu.vector_store %arg8[%c0_11, %c0_12], %13 {strides = array<i32>} : memref<128x128xf32, #tpu.memory_space<vmem>>, vector<128x128xf32>,
    } else {
    }
    %c0 = arith.constant 0 : index
    %c0_1 = arith.constant 0 : index
    %3 = vector.load %arg8[%c0, %c0_1] : memref<128x128xf32, #tpu.memory_space<vmem>>, vector<128x128xf32>
    %c0_2 = arith.constant 0 : index
    %c0_3 = arith.constant 0 : index
    %c0_4 = arith.constant 0 : index
    %4 = vector.load %arg5[%c0_2, %c0_3, %c0_4] : memref<1x128x128xbf16, #tpu.memory_space<vmem>>, vector<1x128x128xbf16>
    %5 = vector.shape_cast %4 : vector<1x128x128xbf16> to vector<128x128xbf16>
    %c0_5 = arith.constant 0 : index
    %c0_6 = arith.constant 0 : index
    %6 = vector.load %arg6[%c0_5, %c0_6] : memref<128x128xbf16, #tpu.memory_space<vmem>>, vector<128x128xbf16>
    %cst = arith.constant dense<0.000000e+00> : vector<128x128xf32>
    %7 = tpu.matmul %5, %6, %cst {dimension_numbers = #tpu.dot_dimension_numbers<[1], [0], [0], [1], [0, 0, 1, 1], [], []>} : vector<128x128xbf16>, vector<128x128xbf16>, vector<128x128xf32> -> vector<128x128xf32>
    %8 = arith.addf %3, %7 : vector<128x128xf32>
    %c0_7 = arith.constant 0 : index
    %c0_8 = arith.constant 0 : index
    %9 = vector.load %arg8[%c0_7, %c0_8] : memref<128x128xf32, #tpu.memory_space<vmem>>, vector<128x128xf32>
    tpu.vector_store %arg8[%c0_7, %c0_8], %8 {strides = array<i32>} : memref<128x128xf32, #tpu.memory_space<vmem>>, vector<128x128xf32>,
    %c1_i32 = arith.constant 1 : i32
    %10 = arith.cmpi eq, %arg2, %c1_i32 : i32
    %11 = arith.extui %10 : i1 to i32
    %c0_i32_9 = arith.constant 0 : i32
    %12 = arith.cmpi ne, %11, %c0_i32_9 : i32
    scf.if %12 {
      %c0_10 = arith.constant 0 : index
      %c0_11 = arith.constant 0 : index
      %13 = vector.load %arg7[%c0_10, %c0_11] : memref<128x128xf32, #tpu.memory_space<vmem>>, vector<128x128xf32>
      %c0_12 = arith.constant 0 : index
      %c0_13 = arith.constant 0 : index
      %14 = vector.load %arg8[%c0_12, %c0_13] : memref<128x128xf32, #tpu.memory_space<vmem>>, vector<128x128xf32>
      %cst_14 = arith.constant 0.333333343 : f32
      %15 = vector.broadcast %cst_14 : f32 to vector<128x128xf32>
      %16 = arith.mulf %15, %14 : vector<128x128xf32>
      %17 = arith.addf %13, %16 : vector<128x128xf32>
      %c0_15 = arith.constant 0 : index
      %c0_16 = arith.constant 0 : index
      %18 = vector.load %arg8[%c0_15, %c0_16] : memref<128x128xf32, #tpu.memory_space<vmem>>, vector<128x128xf32>
      tpu.vector_store %arg8[%c0_15, %c0_16], %17 {strides = array<i32>} : memref<128x128xf32, #tpu.memory_space<vmem>>, vector<128x128xf32>,
    } else {
    }
    return
  }
  func.func @transform_0(%arg0: i32, %arg1: i32, %arg2: i32, %arg3: memref<2x2xi32, #tpu.memory_space<smem>>, %arg4: memref<2x2xi32, #tpu.memory_space<smem>>) -> (i32, i32, i32) {
    %0 = arith.index_cast %arg0 : i32 to index
    %1 = arith.index_cast %arg2 : i32 to index
    %2 = memref.load %arg3[%0, %1] : memref<2x2xi32, #tpu.memory_space<smem>>
    %c0_i32 = arith.constant 0 : i32
    %c0_i32_0 = arith.constant 0 : i32
    %c0_i32_1 = arith.constant 0 : i32
    return %2, %c0_i32, %c0_i32_0 : i32, i32, i32
  }
  func.func @transform_1(%arg0: i32, %arg1: i32, %arg2: i32, %arg3: memref<2x2xi32, #tpu.memory_space<smem>>, %arg4: memref<2x2xi32, #tpu.memory_space<smem>>) -> (i32, i32) {
    %0 = arith.index_cast %arg0 : i32 to index
    %1 = arith.index_cast %arg2 : i32 to index
    %2 = memref.load %arg4[%0, %1] : memref<2x2xi32, #tpu.memory_space<smem>>
    %c0_i32 = arith.constant 0 : i32
    return %2, %arg1 : i32, i32
  }
  func.func @transform_2(%arg0: i32, %arg1: i32, %arg2: i32, %arg3: memref<2x2xi32, #tpu.memory_space<smem>>, %arg4: memref<2x2xi32, #tpu.memory_space<smem>>) -> (i32, i32) {
    %c0_i32 = arith.constant 0 : i32
    return %arg0, %arg1 : i32, i32
  }
  func.func @transform_3(%arg0: i32, %arg1: i32, %arg2: i32, %arg3: memref<2x2xi32, #tpu.memory_space<smem>>, %arg4: memref<2x2xi32, #tpu.memory_space<smem>>) -> (i32, i32) {
    %c0_i32 = arith.constant 0 : i32
    return %arg0, %arg1 : i32, i32
  }
}

</mosaic_0001>

<bundles_post_ra>
// kernel: _lgc_prop_padded.4
= control target key start
LH: loop header
LB: loop body
LE: loop exit
PB: predicated region body
PF: predicated region fallthrough
CT: control target
= control target key end

     0   :  { %s1349_s27 = smov [#allocation3]   ;;  %s1350_s28 = smov [#allocation4]   ;;  %s1666_s0 = inlined_call_operand.hbm [shape: s32[2,2], index: 0, kind: input, shape index: {}]   ;;  %s1667_s2 = inlined_call_operand.hbm [shape: bf16[5,128,128], index: 2, kind: input, shape index: {}]   ;;  %s1668_s3 = inlined_call_operand.vmem [shape: bf16[256,128], index: 3, kind: input, shape index: {}]   ;;  %s1669_s4 = inlined_call_operand.vmem [shape: f32[256,128], index: 4, kind: input, shape index: {}]   ;;  %s1670_s5 = inlined_call_operand.vmem [shape: bf16[256,128], index: 5, kind: output, shape index: {0}]   ;;  %s1671_s6 = inlined_call_operand.vmem [shape: f32[256,128], index: 6, kind: output, shape index: {1}]   ;;  %s1672_s1 = inlined_call_operand.hbm [shape: s32[2,2], index: 1, kind: input, shape index: {}]  }
   0x1   :  { %s13_s23 = sshll.u32 %s1666_s0, 4  ;;  %s18_s26 = sshll.u32 %s1672_s1, 4  ;;  %s14_s23 = int_to_ptr.hbm [resolvable:$true] %s13_s23  ;;  %s19_s26 = int_to_ptr.hbm [resolvable:$true] %s18_s26 }
   0x2   :  { %16 = dma.hbm_to_smem %s14_s23, 32, %s1349_s27, [#allocation2] }
   0x3   :  { %21 = dma.hbm_to_smem %s19_s26, 32, %s1350_s28, [#allocation2] }
   0x4   :  { %1311 = dma.done.wait [#allocation2], 64 }
   0x5   :  { %1312 = vsyncadd [#allocation2], 4294967232 }
   0x6   :  { %24 = sfence }
   0x7   :  { %25 = vsyncpa [#allocation6], 0 }
   0x8   :  { %27 = vsyncpa [#allocation6 + $0x1], 0  ;;  %s1395_s29 = smov 0   ;;  %s1397_s30 = smov 0  }
   0x9   :  { %s1399_s0 = smov 0   ;;  %s1401_s7 = smov 0  }
   0xa   :  { %s1403_s1 = smov 0   ;;  %s1405_s8 = smov 0  }
   0xb   :  { %s1407_s9 = smov 0   ;;  %s1409_s10 = smov 0  }
   0xc LB: > { %s45_s11 = sadd.s32 1, %s1339_s8  ;;  %s52_s12 = sadd.s32 1, %s1343_s9  ;;  %s1347_s10 = sphi %s1409_s10, %s33_s10   ;;  %s1343_s9 = sphi %s1407_s9, %s1688_s9   ;;  %s1339_s8 = sphi %s1405_s8, %s1687_s8   ;;  %s1335_s1 = sphi %s1403_s1, %s1686_s1   ;;  %s1331_s7 = sphi %s1401_s7, %s1685_s7   ;;  %s1327_s0 = sphi %s1399_s0, %s1684_s0   ;;  %s1323_s30 = sphi %s1397_s30, %s1683_s30   ;;  %s1319_s29 = sphi %s1395_s29, %s1682_s29  }
   0xd   : > { %p46_p0 = scmp.ge.s32.totalorder %s45_s11, 2  ;;  %s56_s13 = sshra.s32 %s1339_s8, 7 }
   0xe   : > { %s58_s14 = sadd.s32 %s1343_s9, %s56_s13  ;;  %s61_s15 = sand.u32 127, %s1339_s8 }
   0xf   : > { %s1690_s11 = smov (%p46_p0, %s45_s11), 0  ;;  %s1692_s12 = smov (!%p46_p0, %s52_s12), %s1343_s9 }
  0x10   : > { %1675 = sst [smem:[#allocation11_spill]] %s1690_s11  ;;  %p54_p1 = scmp.ge.s32.totalorder %s1692_s12, 2 }
  0x11   : > { %s968_s16 = sshll.u32 %s58_s14, 7  ;;  %s966_s17 = sadd.s32 4294967295, %s1347_s10  }
  0x12   : > { %s64_s18 = sshra.s32 %s1690_s11, 7  ;;  %s1694_s12 = smov (%p54_p1, %s1692_s12), 0 }
  0x13   : > { %1676 = sst [smem:[#allocation12_spill]] %s1694_s12  ;;  %s62_s19 = sadd.s32 %s968_s16, %s61_s15 }
  0x14   : > { %s69_s20 = sand.u32 127, %s1690_s11  ;;  %s63_s21 = sld [smem:[#allocation3 + %s62_s19]] }
  0x15   : > { %s66_s22 = sadd.s32 %s64_s18, %s1694_s12  ;;  %p82_p2 = scmp.ne.s32.totalorder %s1327_s0, %s1323_s30 }
  0x16   : > { %s969_s23 = sshll.u32 %s66_s22, 7  ;;  %p88_p3 = scmp.ne.s32.totalorder %s1323_s30, %s1319_s29 }
  0x17   : > { %s70_s24 = sadd.s32 %s969_s23, %s69_s20  ;;  %p83_p4 = scmp.eq.s32.totalorder %s1347_s10, 0 }
  0x18   : > { %s71_s25 = sld [smem:[#allocation3 + %s70_s24]]  ;;  %p89_p5 = scmp.eq.s32.totalorder %s966_s17, 0 }
  0x19   : > { %s240_s27 = sand.u32 1, %s1327_s0   ;;  %p84_p7 = por %p83_p4, %p82_p2 }
  0x1a   : > { %p1454_p6 = por %p89_p5, %p88_p3  ;;  %s75_s28 = sadd.s32 1, %s1327_s0 }
  0x1b   : > { %p1155_p8 = scmp.lt.s32.totalorder %s1347_s10, 4  ;;  %s974_s14 = sshll.u32 %s240_s27, 6 }
  0x1c   : > { %s1145_s29 = scalar_select %p84_p7, [#allocation3], [#allocation7] }
  0x1d   : > { %p1461_p10 = pnand %p1155_p8, %p84_p7  ;;  %s1696_s19 = smov (!%p84_p7, %s62_s19), 0 }
  0x1e   : > { %s72_s13 = ssub.s32 %s63_s21, %s71_s25  ;;  %s1698_s29 = smov (!%p1155_p8, %s1145_s29), [#allocation8] }
  0x1f   : > { %p73_p9 = scmp.eq.s32.totalorder %s72_s13, 0  ;;  %s1700_s19 = smov (!%p1155_p8, %s1696_s19), 0 }
  0x20   : > { %s252_s17 = sld [smem:[%s1698_s29 + %s1700_s19]]  ;;  %p978_p11 = scmp.ge.s32.totalorder %s1347_s10, 1 }
  0x21   : > { %s1466_s16 = scalar_select %p73_p9, %s1327_s0, %s75_s28  }
  0x22   : > { %p308_p12 = scmp.lt.s32.totalorder %s1347_s10, 5  ;;  %s244_s18 = scalar_lea.vmem [#allocation5], %s974_s14 }
  0x23   : > { %s260_s20 = sshll.u32 %s244_s18, 4  ;;  %s241_s13 = scalar_lea.sflag [#allocation6], %s240_s27  ;;  %s261_s20 = int_to_ptr.vmem [resolvable:$true] %s260_s20 }
  0x24   : > { %p1470_p13 = pnand %p978_p11, %p308_p12  ;;  %p1253_p1 = pneg %p1461_p10 }
  0x26   : > { %s1057_s22 = sshll.u32 %s252_s17, 6  ;;  %s1256_s17 = scalar_lea.hbm %s1667_s2, 320 }
  0x27   : > { %s257_s25 = scalar_lea.hbm %s1667_s2, %s1057_s22 }
  0x28   : > { %s258_s28 = sshll.u32 %s257_s25, 4  ;;  %s259_s28 = int_to_ptr.hbm [resolvable:$true] %s258_s28 }
  0x29   : > { %s1249_s12 = sshra.s32 %s259_s28, 4  ;;  %s1250_s12 = int_to_ptr.hbm [resolvable:$true] %s1249_s12 }
  0x2a   : > { %s1251_s19 = scalar_lea.hbm %s1250_s12, 64  ;;  %p1257_p4 = scmp.lt.s32.totalorder %s1250_s12, %s1667_s2 }
  0x2b   : > { %p1252_p0 = scmp.ne.s32.totalorder %s1250_s12, %s1251_s19  ;;  %p1258_p5 = scmp.lt.s32.totalorder %s1256_s17, %s1251_s19 }
  0x2d   : > { %p1254_p2 = pnand %p1253_p1, %p1252_p0  ;;  %p1259_p7 = por %p1258_p5, %p1257_p4 }
  0x2f   : > { %p1255_p3 = pneg %p1254_p2 }
  0x31   : > { %p1260_p8 = pnand %p1259_p7, %p1255_p3 }
  0x33   : > { %1263 = shalt.err (!%p1260_p8)
}
  0x34   : > { %s1351_s27 = smov 64   ;;  %s1352_s22 = smov 4  }
  0x35   : > { %1154 = dma.hbm_to_vmem [thread:$0]  (!%p1461_p10), %s259_s28, 1024, %s261_s20, %s241_s13, %s1351_s27, %s1351_s27, %s1352_s22  }
  0x36   : > { %312 = sbr.rel (%p1470_p13) target bundleno = 313 (0x139), region = 32  ;;  %s314_s23 = sand.u32 (!%p1470_p13), 1, %s1323_s30  }
  0x37   : > { %s979_s24 = sshll.u32 (!%p1470_p13), %s314_s23, 6  ;;  %s315_s25 = scalar_lea.sflag (!%p1470_p13), [#allocation6], %s314_s23 }
  0x38   : > { %s1490_s14 = scalar_lea.vmem (!%p1470_p13), [#allocation5], %s979_s24 }
  0x3b   : > { %1314 = dma.done.wait (%p1454_p6), %s315_s25, 1024  }
  0x3c   : > { %1316 = vsyncadd (%p1454_p6), %s315_s25, 4294966272  ;;  %s387_s11 = sshra.s32 %s1331_s7, 7  ;;  %s392_s12 = sand.u32 127, %s1331_s7 }
  0x3d   : > { %s389_s15 = sadd.s32 %s1335_s1, %s387_s11  ;;  %s983_s20 = sshll.u32 %s1335_s1, 4 }
  0x3e   : > { %s980_s21 = sshll.u32 %s389_s15, 7  ;;  %p413_p9 = scmp.lt.s32.totalorder %s983_s20, 31 }
  0x3f   : > { %s393_s28 = sadd.s32 %s980_s21, %s392_s12  ;;  %p989_p10 = scmp.ne.s32.totalorder %s1331_s7, 0 }
  0x40   : > { %s394_s13 = sld [smem:[#allocation4 + %s393_s28]]  ;;  %s1702_s20 = smov (!%p413_p9, %s983_s20), 31 }
  0x41   : > { %s984_s19 = sshll.u32 %s1702_s20, 3  ;;  %s986_s29 = sshll.u32 %s1702_s20, 2 }
  0x42   : > { %s1503_s26 = scalar_lea.vmem %s1669_s4, %s984_s19  ;;  %s1508_s23 = scalar_lea.vmem %s1670_s5, %s986_s29 }
  0x43   : > { %s1513_s1 = scalar_lea.vmem %s1671_s6, %s984_s19 }
  0x46   : > { %s981_s11 = sshll.u32 %s394_s13, 4 }
  0x47   : > { %p396_p6 = scmp.lt.s32.totalorder %s981_s11, 31  ;;  %442 = sbr.rel (%p989_p10) target bundleno = 93 (0x5d), region = 40 }
  0x49   : > { %s1704_s11 = smov (!%p396_p6, %s981_s11), 31 }
  0x4a   : > { %s982_s12 = sshll.u32 %s1704_s11, 2 }
  0x4b   : > { %s1518_s21 = scalar_lea.vmem %s1668_s3, %s982_s12 }
  0x4c   : > { %v1353_v0 = vmov 0.0  }
  0x4d   : > { %443 = vst [vmem:[%s1513_s1] sm:$0xff] %v1353_v0 }
  0x4e   : > { %444 = vst [vmem:[%s1513_s1 + $0x8] sm:$0xff] %v1353_v0 }
  0x4f   : > { %445 = vst [vmem:[%s1513_s1 + $0x10] sm:$0xff] %v1353_v0 }
  0x50   : > { %446 = vst [vmem:[%s1513_s1 + $0x18] sm:$0xff] %v1353_v0 }
  0x51   : > { %447 = vst [vmem:[%s1513_s1 + $0x20] sm:$0xff] %v1353_v0 }
  0x52   : > { %448 = vst [vmem:[%s1513_s1 + $0x28] sm:$0xff] %v1353_v0 }
  0x53   : > { %449 = vst [vmem:[%s1513_s1 + $0x30] sm:$0xff] %v1353_v0 }
  0x54   : > { %450 = vst [vmem:[%s1513_s1 + $0x38] sm:$0xff] %v1353_v0 }
  0x55   : > { %451 = vst [vmem:[%s1513_s1 + $0x40] sm:$0xff] %v1353_v0 }
  0x56   : > { %452 = vst [vmem:[%s1513_s1 + $0x48] sm:$0xff] %v1353_v0 }
  0x57   : > { %453 = vst [vmem:[%s1513_s1 + $0x50] sm:$0xff] %v1353_v0 }
  0x58   : > { %454 = vst [vmem:[%s1513_s1 + $0x58] sm:$0xff] %v1353_v0 }
  0x59   : > { %455 = vst [vmem:[%s1513_s1 + $0x60] sm:$0xff] %v1353_v0 }
  0x5a   : > { %456 = vst [vmem:[%s1513_s1 + $0x68] sm:$0xff] %v1353_v0 }
  0x5b   : > { %457 = vst [vmem:[%s1513_s1 + $0x70] sm:$0xff] %v1353_v0 }
  0x5c   : > { %458 = vst [vmem:[%s1513_s1 + $0x78] sm:$0xff] %v1353_v0 }
  0x5d PF: > { %v1073_v1 = vld [vmem:[%s1518_s21 + $0x38] sm:$0xff]  ;;  %v1072_v2 = vld [vmem:[%s1518_s21 + $0x30] sm:$0xff]  ;;  %v1071_v3 = vld [vmem:[%s1518_s21 + $0x28] sm:$0xff]  ;;  %p1054_p11 = scmp.ne.s32.totalorder %s1331_s7, 1 }
  0x5e   : > { %603 = vmatpush.bf16.msra.mxu0 %v1073_v1  ;;  %1121 = vmatpush.bf16.msra.mxu1 %v1073_v1  ;;  %v1070_v4 = vld [vmem:[%s1518_s21 + $0x20] sm:$0xff]  ;;  %v1069_v5 = vld [vmem:[%s1518_s21 + $0x18] sm:$0xff]  ;;  %v1068_v6 = vld [vmem:[%s1518_s21 + $0x10] sm:$0xff] }
  0x5f   : > { %1122 = vmatpush.bf16.msra.mxu2 %v1073_v1  ;;  %1123 = vmatpush.bf16.msra.mxu3 %v1073_v1  ;;  %v1067_v7 = vld [vmem:[%s1518_s21 + $0x8] sm:$0xff]  ;;  %v1066_v8 = vld [vmem:[%s1518_s21] sm:$0xff]  ;;  %v1060_v10 = vld [vmem:[%s1490_s14 + $0x10] sm:$0xff] }
  0x60   : > { %v1058_v9 = vld [vmem:[%s1490_s14] sm:$0xff]  ;;  %v1064_v12 = vld [vmem:[%s1490_s14 + $0x30] sm:$0xff]  ;;  %v1059_v13 = vld [vmem:[%s1490_s14 + $0x8] sm:$0xff] }
  0x61   : > { %v1062_v11 = vld [vmem:[%s1490_s14 + $0x20] sm:$0xff]  ;;  %v1061_v14 = vld [vmem:[%s1490_s14 + $0x18] sm:$0xff]  ;;  %v1063_v15 = vld [vmem:[%s1490_s14 + $0x28] sm:$0xff] }
  0x62   : > { %604 = vmatpush.bf16.msra.mxu0 %v1072_v2  ;;  %1124 = vmatpush.bf16.msra.mxu1 %v1072_v2  ;;  %v1065_v16 = vld [vmem:[%s1490_s14 + $0x38] sm:$0xff]  ;;  %v459_v17 = vld [vmem:[%s1513_s1] sm:$0xff]  ;;  %v460_v25 = vld [vmem:[%s1513_s1 + $0x8] sm:$0xff] }
  0x63   : > { %1125 = vmatpush.bf16.msra.mxu2 %v1072_v2  ;;  %1126 = vmatpush.bf16.msra.mxu3 %v1072_v2  ;;  %v463_v18 = vld [vmem:[%s1513_s1 + $0x20] sm:$0xff]  ;;  %v464_v26 = vld [vmem:[%s1513_s1 + $0x28] sm:$0xff]  ;;  %v461_v37 = vld [vmem:[%s1513_s1 + $0x10] sm:$0xff] }
  0x64   : > { %v467_v23 = vld [vmem:[%s1513_s1 + $0x40] sm:$0xff]  ;;  %v468_v35 = vld [vmem:[%s1513_s1 + $0x48] sm:$0xff]  ;;  %v465_v38 = vld [vmem:[%s1513_s1 + $0x30] sm:$0xff] }
  0x65   : > { %v471_v24 = vld [vmem:[%s1513_s1 + $0x60] sm:$0xff]  ;;  %v472_v36 = vld [vmem:[%s1513_s1 + $0x68] sm:$0xff]  ;;  %v469_v47 = vld [vmem:[%s1513_s1 + $0x50] sm:$0xff] }
  0x66   : > { %605 = vmatpush.bf16.msra.mxu0 %v1071_v3  ;;  %1127 = vmatpush.bf16.msra.mxu1 %v1071_v3  ;;  %v473_v48 = vld [vmem:[%s1513_s1 + $0x70] sm:$0xff]  ;;  %v462_v49 = vld [vmem:[%s1513_s1 + $0x18] sm:$0xff] }
  0x67   : > { %1128 = vmatpush.bf16.msra.mxu2 %v1071_v3  ;;  %1129 = vmatpush.bf16.msra.mxu3 %v1071_v3  ;;  %v466_v50 = vld [vmem:[%s1513_s1 + $0x38] sm:$0xff] }
  0x68   : > { %v470_v59 = vld [vmem:[%s1513_s1 + $0x58] sm:$0xff] }
  0x69   : > { %v474_v60 = vld [vmem:[%s1513_s1 + $0x78] sm:$0xff] }
  0x6a   : > { %606 = vmatpush.bf16.msra.mxu0 %v1070_v4  ;;  %1130 = vmatpush.bf16.msra.mxu1 %v1070_v4 }
  0x6b   : > { %1131 = vmatpush.bf16.msra.mxu2 %v1070_v4  ;;  %1132 = vmatpush.bf16.msra.mxu3 %v1070_v4 }
  0x6e   : > { %607 = vmatpush.bf16.msra.mxu0 %v1069_v5  ;;  %1133 = vmatpush.bf16.msra.mxu1 %v1069_v5 }
  0x6f   : > { %1134 = vmatpush.bf16.msra.mxu2 %v1069_v5  ;;  %1135 = vmatpush.bf16.msra.mxu3 %v1069_v5 }
  0x72   : > { %608 = vmatpush.bf16.msra.mxu0 %v1068_v6  ;;  %1136 = vmatpush.bf16.msra.mxu1 %v1068_v6 }
  0x73   : > { %1137 = vmatpush.bf16.msra.mxu2 %v1068_v6  ;;  %1138 = vmatpush.bf16.msra.mxu3 %v1068_v6 }
  0x76   : > { %609 = vmatpush.bf16.msra.mxu0 %v1067_v7  ;;  %1139 = vmatpush.bf16.msra.mxu1 %v1067_v7 }
  0x77   : > { %1140 = vmatpush.bf16.msra.mxu2 %v1067_v7  ;;  %1141 = vmatpush.bf16.msra.mxu3 %v1067_v7 }
  0x7a   : > { %610 = vmatpush.bf16.msra.mxu0 %v1066_v8  ;;  %1142 = vmatpush.bf16.msra.mxu1 %v1066_v8 }
  0x7b   : > { %1143 = vmatpush.bf16.msra.mxu2 %v1066_v8  ;;  %1144 = vmatpush.bf16.msra.mxu3 %v1066_v8 }
  0x7d   : > { %611 = vmatmul.bf16.vlgmr.msra.gmra.mxu0 %v1058_v9  ;;  %621 = vmatmul.bf16.vlgmr.msra.gmra.mxu1 %v1060_v10 }
  0x7e   : > { %631 = vmatmul.bf16.vlgmr.msra.gmra.mxu2 %v1062_v11  ;;  %641 = vmatmul.bf16.vlgmr.msra.gmra.mxu3 %v1064_v12 }
  0x8d   : > { %616 = vmatmul.bf16.gmra.mxu0 %v1059_v13  ;;  %626 = vmatmul.bf16.gmra.mxu1 %v1061_v14 }
  0x8e   : > { %636 = vmatmul.bf16.gmra.mxu2 %v1063_v15  ;;  %646 = vmatmul.bf16.gmra.mxu3 %v1065_v16 }
  0xfa   : > { %v612_v19 = vpop.f32.mrf.mxu0  ;;  %v622_v20 = vpop.f32.mrf.mxu1 }
  0xfb   : > { %v652_v21 = vadd.f32 %v612_v19, %v459_v17  ;;  %v656_v22 = vadd.f32 %v622_v20, %v463_v18 }
  0xfd   : > { %668 = vst [vmem:[%s1513_s1] sm:$0xff] %v652_v21 }
  0xfe   : > { %672 = vst [vmem:[%s1513_s1 + $0x20] sm:$0xff] %v656_v22 }
 0x101   : > { %v632_v27 = vpop.f32.mrf.mxu2  ;;  %v642_v28 = vpop.f32.mrf.mxu3 }
 0x102   : > { %v660_v29 = vadd.f32 %v632_v27, %v467_v23  ;;  %v664_v30 = vadd.f32 %v642_v28, %v471_v24  ;;  %v614_v31 = vpop.f32.mrf.mxu0  ;;  %v624_v32 = vpop.f32.mrf.mxu1 }
 0x103   : > { %v653_v33 = vadd.f32 %v614_v31, %v460_v25  ;;  %v657_v34 = vadd.f32 %v624_v32, %v464_v26 }
 0x104   : > { %676 = vst [vmem:[%s1513_s1 + $0x40] sm:$0xff] %v660_v29 }
 0x105   : > { %680 = vst [vmem:[%s1513_s1 + $0x60] sm:$0xff] %v664_v30 }
 0x106   : > { %669 = vst [vmem:[%s1513_s1 + $0x8] sm:$0xff] %v653_v33 }
 0x107   : > { %673 = vst [vmem:[%s1513_s1 + $0x28] sm:$0xff] %v657_v34 }
 0x109   : > { %v634_v39 = vpop.f32.mrf.mxu2  ;;  %v644_v40 = vpop.f32.mrf.mxu3 }
 0x10a   : > { %v661_v41 = vadd.f32 %v634_v39, %v468_v35  ;;  %v665_v42 = vadd.f32 %v644_v40, %v472_v36  ;;  %v617_v43 = vpop.f32.mrf.mxu0  ;;  %v627_v44 = vpop.f32.mrf.mxu1 }
 0x10b   : > { %v654_v45 = vadd.f32 %v617_v43, %v461_v37  ;;  %v658_v46 = vadd.f32 %v627_v44, %v465_v38 }
 0x10c   : > { %677 = vst [vmem:[%s1513_s1 + $0x48] sm:$0xff] %v661_v41 }
 0x10d   : > { %681 = vst [vmem:[%s1513_s1 + $0x68] sm:$0xff] %v665_v42 }
 0x10e   : > { %670 = vst [vmem:[%s1513_s1 + $0x10] sm:$0xff] %v654_v45 }
 0x10f   : > { %674 = vst [vmem:[%s1513_s1 + $0x30] sm:$0xff] %v658_v46 }
 0x111   : > { %v637_v51 = vpop.f32.mrf.mxu2  ;;  %v647_v52 = vpop.f32.mrf.mxu3 }
 0x112   : > { %v662_v53 = vadd.f32 %v637_v51, %v469_v47  ;;  %v666_v54 = vadd.f32 %v647_v52, %v473_v48  ;;  %v619_v55 = vpop.f32.mrf.mxu0  ;;  %v629_v56 = vpop.f32.mrf.mxu1 }
 0x113   : > { %v655_v57 = vadd.f32 %v619_v55, %v462_v49  ;;  %v659_v58 = vadd.f32 %v629_v56, %v466_v50 }
 0x114   : > { %678 = vst [vmem:[%s1513_s1 + $0x50] sm:$0xff] %v662_v53 }
 0x115   : > { %682 = vst [vmem:[%s1513_s1 + $0x70] sm:$0xff] %v666_v54 }
 0x116   : > { %671 = vst [vmem:[%s1513_s1 + $0x18] sm:$0xff] %v655_v57 }
 0x117   : > { %675 = vst [vmem:[%s1513_s1 + $0x38] sm:$0xff] %v659_v58 }
 0x119   : > { %v639_v61 = vpop.f32.mrf.mxu2  ;;  %v649_v62 = vpop.f32.mrf.mxu3  ;;  %687 = sbr.rel (%p1054_p11) target bundleno = 313 (0x139), region = 44 }
 0x11a   : > { %v663_v63 = vadd.f32 %v639_v61, %v470_v59  ;;  %v667_v0 = vadd.f32 %v649_v62, %v474_v60 }
 0x11c   : > { %679 = vst [vmem:[%s1513_s1 + $0x58] sm:$0xff] %v663_v63 }
 0x11d   : > { %683 = vst [vmem:[%s1513_s1 + $0x78] sm:$0xff] %v667_v0 }
 0x11e   : > { %v688_v1 = vld [vmem:[%s1513_s1] sm:$0xff]  ;;  %v689_v2 = vld [vmem:[%s1513_s1 + $0x8] sm:$0xff]  ;;  %v690_v3 = vld [vmem:[%s1513_s1 + $0x10] sm:$0xff] }
 0x11f   : > { %v1077_v4 = vpack.c.bf16 %v689_v2, %v688_v1  ;;  %v691_v5 = vld [vmem:[%s1513_s1 + $0x18] sm:$0xff]  ;;  %v692_v6 = vld [vmem:[%s1513_s1 + $0x20] sm:$0xff]  ;;  %v693_v7 = vld [vmem:[%s1513_s1 + $0x28] sm:$0xff]  ;;  %v752_v17 = vmul.f32 0.33333334, %v688_v1 }
 0x120   : > { %v1082_v8 = vpack.c.bf16 %v691_v5, %v690_v3  ;;  %v1087_v9 = vpack.c.bf16 %v693_v7, %v692_v6  ;;  %v694_v10 = vld [vmem:[%s1513_s1 + $0x30] sm:$0xff]  ;;  %v695_v11 = vld [vmem:[%s1513_s1 + $0x38] sm:$0xff]  ;;  %v696_v12 = vld [vmem:[%s1513_s1 + $0x40] sm:$0xff]  ;;  %v753_v23 = vmul.f32 0.33333334, %v689_v2 }
 0x121   : > { %1078 = vst [vmem:[%s1508_s23] sm:$0xff] %v1077_v4   ;;  %v1092_v13 = vpack.c.bf16 %v695_v11, %v694_v10  ;;  %v697_v14 = vld [vmem:[%s1513_s1 + $0x48] sm:$0xff]  ;;  %v698_v15 = vld [vmem:[%s1513_s1 + $0x50] sm:$0xff]  ;;  %v700_v20 = vld [vmem:[%s1513_s1 + $0x60] sm:$0xff]  ;;  %v754_v28 = vmul.f32 0.33333334, %v690_v3 }
 0x122   : > { %1114 = vst [vmem:[%s1508_s23 + $0x8] sm:$0xff] %v1082_v8   ;;  %v1097_v18 = vpack.c.bf16 %v697_v14, %v696_v12  ;;  %v701_v21 = vld [vmem:[%s1513_s1 + $0x68] sm:$0xff]  ;;  %v702_v22 = vld [vmem:[%s1513_s1 + $0x70] sm:$0xff]  ;;  %v736_v26 = vld [vmem:[%s1503_s26] sm:$0xff]  ;;  %v755_v31 = vmul.f32 0.33333334, %v691_v5 }
 0x123   : > { %v699_v16 = vld [vmem:[%s1513_s1 + $0x58] sm:$0xff]  ;;  %1115 = vst [vmem:[%s1508_s23 + $0x10] sm:$0xff] %v1087_v9   ;;  %v1107_v24 = vpack.c.bf16 %v701_v21, %v700_v20  ;;  %v737_v27 = vld [vmem:[%s1503_s26 + $0x8] sm:$0xff]  ;;  %v738_v30 = vld [vmem:[%s1503_s26 + $0x10] sm:$0xff]  ;;  %v768_v32 = vadd.f32 %v752_v17, %v736_v26  ;;  %v756_v34 = vmul.f32 0.33333334, %v692_v6 }
 0x124   : > { %v1102_v19 = vpack.c.bf16 %v699_v16, %v698_v15  ;;  %v703_v25 = vld [vmem:[%s1513_s1 + $0x78] sm:$0xff]  ;;  %1116 = vst [vmem:[%s1508_s23 + $0x18] sm:$0xff] %v1092_v13   ;;  %v769_v35 = vadd.f32 %v753_v23, %v737_v27  ;;  %v740_v36 = vld [vmem:[%s1503_s26 + $0x20] sm:$0xff]  ;;  %v757_v37 = vmul.f32 0.33333334, %v693_v7  ;;  %v770_v38 = vadd.f32 %v754_v28, %v738_v30  ;;  %v741_v39 = vld [vmem:[%s1503_s26 + $0x28] sm:$0xff] }
 0x125   : > { %v1112_v29 = vpack.c.bf16 %v703_v25, %v702_v22  ;;  %1117 = vst [vmem:[%s1508_s23 + $0x20] sm:$0xff] %v1097_v18   ;;  %v739_v33 = vld [vmem:[%s1503_s26 + $0x18] sm:$0xff]  ;;  %v758_v40 = vmul.f32 0.33333334, %v694_v10  ;;  %v742_v42 = vld [vmem:[%s1503_s26 + $0x30] sm:$0xff]  ;;  %v772_v44 = vadd.f32 %v756_v34, %v740_v36  ;;  %v744_v48 = vld [vmem:[%s1503_s26 + $0x40] sm:$0xff] }
 0x126   : > { %1118 = vst [vmem:[%s1508_s23 + $0x28] sm:$0xff] %v1102_v19   ;;  %v771_v41 = vadd.f32 %v755_v31, %v739_v33  ;;  %v759_v43 = vmul.f32 0.33333334, %v695_v11  ;;  %v743_v45 = vld [vmem:[%s1503_s26 + $0x38] sm:$0xff]  ;;  %v760_v46 = vmul.f32 0.33333334, %v696_v12  ;;  %v773_v47 = vadd.f32 %v757_v37, %v741_v39 }
 0x127   : > { %1119 = vst [vmem:[%s1508_s23 + $0x30] sm:$0xff] %v1107_v24   ;;  %v761_v49 = vmul.f32 0.33333334, %v697_v14  ;;  %v774_v50 = vadd.f32 %v758_v40, %v742_v42  ;;  %v745_v51 = vld [vmem:[%s1503_s26 + $0x48] sm:$0xff]  ;;  %v762_v52 = vmul.f32 0.33333334, %v698_v15 }
 0x128   : > { %1120 = vst [vmem:[%s1508_s23 + $0x38] sm:$0xff] %v1112_v29   ;;  %v775_v53 = vadd.f32 %v759_v43, %v743_v45  ;;  %v746_v54 = vld [vmem:[%s1503_s26 + $0x50] sm:$0xff]  ;;  %v763_v55 = vmul.f32 0.33333334, %v699_v16  ;;  %v776_v56 = vadd.f32 %v760_v46, %v744_v48  ;;  %v747_v57 = vld [vmem:[%s1503_s26 + $0x58] sm:$0xff]  ;;  %v748_v60 = vld [vmem:[%s1503_s26 + $0x60] sm:$0xff] }
 0x129   : > { %784 = vst [vmem:[%s1513_s1] sm:$0xff] %v768_v32  ;;  %v764_v58 = vmul.f32 0.33333334, %v700_v20  ;;  %v777_v59 = vadd.f32 %v761_v49, %v745_v51  ;;  %v765_v61 = vmul.f32 0.33333334, %v701_v21  ;;  %v778_v62 = vadd.f32 %v762_v52, %v746_v54  ;;  %v749_v63 = vld [vmem:[%s1503_s26 + $0x68] sm:$0xff]  ;;  %v750_v2 = vld [vmem:[%s1503_s26 + $0x70] sm:$0xff] }
 0x12a   : > { %785 = vst [vmem:[%s1513_s1 + $0x8] sm:$0xff] %v769_v35  ;;  %v766_v0 = vmul.f32 0.33333334, %v702_v22  ;;  %v779_v1 = vadd.f32 %v763_v55, %v747_v57  ;;  %v767_v3 = vmul.f32 0.33333334, %v703_v25  ;;  %v751_v5 = vld [vmem:[%s1503_s26 + $0x78] sm:$0xff] }
 0x12b   : > { %786 = vst [vmem:[%s1513_s1 + $0x10] sm:$0xff] %v770_v38  ;;  %v780_v4 = vadd.f32 %v764_v58, %v748_v60  ;;  %v781_v6 = vadd.f32 %v765_v61, %v749_v63 }
 0x12c   : > { %787 = vst [vmem:[%s1513_s1 + $0x18] sm:$0xff] %v771_v41  ;;  %v782_v7 = vadd.f32 %v766_v0, %v750_v2  ;;  %v783_v8 = vadd.f32 %v767_v3, %v751_v5 }
 0x12d   : > { %788 = vst [vmem:[%s1513_s1 + $0x20] sm:$0xff] %v772_v44 }
 0x12e   : > { %789 = vst [vmem:[%s1513_s1 + $0x28] sm:$0xff] %v773_v47 }
 0x12f   : > { %790 = vst [vmem:[%s1513_s1 + $0x30] sm:$0xff] %v774_v50 }
 0x130   : > { %791 = vst [vmem:[%s1513_s1 + $0x38] sm:$0xff] %v775_v53 }
 0x131   : > { %792 = vst [vmem:[%s1513_s1 + $0x40] sm:$0xff] %v776_v56 }
 0x132   : > { %793 = vst [vmem:[%s1513_s1 + $0x48] sm:$0xff] %v777_v59 }
 0x133   : > { %794 = vst [vmem:[%s1513_s1 + $0x50] sm:$0xff] %v778_v62 }
 0x134   : > { %795 = vst [vmem:[%s1513_s1 + $0x58] sm:$0xff] %v779_v1 }
 0x135   : > { %796 = vst [vmem:[%s1513_s1 + $0x60] sm:$0xff] %v780_v4 }
 0x136   : > { %797 = vst [vmem:[%s1513_s1 + $0x68] sm:$0xff] %v781_v6 }
 0x137   : > { %798 = vst [vmem:[%s1513_s1 + $0x70] sm:$0xff] %v782_v7 }
 0x138   : > { %799 = vst [vmem:[%s1513_s1 + $0x78] sm:$0xff] %v783_v8 }
 0x139 PF: > { %s33_s10 = sadd.s32 1, %s1347_s10   ;;  %s1680_s14 = sld [smem:[#allocation11_spill]] }
 0x13a   : > { %p30_p12 = scmp.ge.s32.totalorder %s33_s10, 6   ;;  %s1681_s28 = sld [smem:[#allocation12_spill]] }
 0x13b   : > { %s1682_s29 = smov %s1323_s30  ;;  %s1683_s30 = smov %s1327_s0 }
 0x13c   : > { %s1684_s0 = smov %s1466_s16  ;;  %s1685_s7 = smov %s1339_s8 }
 0x13d   : > { %s1686_s1 = smov %s1343_s9  ;;  %32 = sbr.rel (!%p30_p12) target bundleno = 12 (0xc), region = 98 }
 0x13f   : > { %s1687_s8 = smov %s1680_s14 }
 0x140   : > { %s1688_s9 = smov %s1681_s28 }
 0x142   :  { %851 = vsyncpa [#allocation6], 1 }
 0x143   :  { %853 = vsyncpa [#allocation6 + $0x1], 1 }

// kernel: _lgc_prop_padded.6
= control target key start
LH: loop header
LB: loop body
LE: loop exit
PB: predicated region body
PF: predicated region fallthrough
CT: control target
= control target key end

     0   :  { %s1167_s24 = smov [#allocation3]   ;;  %s1168_s25 = smov [#allocation4]   ;;  %s1460_s0 = inlined_call_operand.vmem [shape: s32[2,2], index: 0, kind: input, shape index: {}]   ;;  %s1461_s2 = inlined_call_operand.vmem [shape: bf16[5,128,128], index: 2, kind: input, shape index: {}]   ;;  %s1462_s3 = inlined_call_operand.vmem [shape: bf16[256,128], index: 3, kind: input, shape index: {}]   ;;  %s1463_s4 = inlined_call_operand.vmem [shape: f32[256,128], index: 4, kind: input, shape index: {}]   ;;  %s1464_s5 = inlined_call_operand.hbm [shape: f32[256,128], index: 5, kind: output, shape index: {}]   ;;  %s1465_s1 = inlined_call_operand.vmem [shape: s32[2,2], index: 1, kind: input, shape index: {}]  }
   0x1   :  { %s11_s20 = sshll.u32 %s1460_s0, 4  ;;  %s16_s23 = sshll.u32 %s1465_s1, 4  ;;  %s12_s20 = int_to_ptr.vmem [resolvable:$true] %s11_s20  ;;  %s17_s23 = int_to_ptr.vmem [resolvable:$true] %s16_s23 }
   0x2   :  { %14 = dma.vmem_to_smem %s12_s20, 32, %s1167_s24, [#allocation2] }
   0x3   :  { %19 = dma.vmem_to_smem %s17_s23, 32, %s1168_s25, [#allocation2] }
   0x4   :  { %1129 = dma.done.wait [#allocation2], 64 }
   0x5   :  { %1130 = vsyncadd [#allocation2], 4294967232 }
   0x6   :  { %22 = sfence }
   0x7   :  { %23 = vsyncpa [#allocation6], 0 }
   0x8   :  { %25 = vsyncpa [#allocation6 + $0x1], 0  ;;  %s1208_s26 = smov 0   ;;  %s1210_s27 = smov 0  }
   0x9   :  { %s1212_s0 = smov 0   ;;  %s1214_s28 = smov 0  }
   0xa   :  { %s1216_s1 = smov 0   ;;  %s1218_s29 = smov 0  }
   0xb   :  { %s1220_s30 = smov 0   ;;  %s1222_s6 = smov 0  }
   0xc LB: > { %s838_s7 = sadd.s32 4294967295, %s1165_s6   ;;  %s839_s8 = sadd.s32 4294967294, %s1165_s6   ;;  %s1165_s6 = sphi %s1222_s6, %s31_s6   ;;  %s1161_s30 = sphi %s1220_s30, %s1481_s30   ;;  %s1157_s29 = sphi %s1218_s29, %s1480_s29   ;;  %s1153_s1 = sphi %s1216_s1, %s1479_s1   ;;  %s1149_s28 = sphi %s1214_s28, %s1478_s28   ;;  %s1145_s0 = sphi %s1212_s0, %s1477_s0   ;;  %s1141_s27 = sphi %s1210_s27, %s1476_s27   ;;  %s1137_s26 = sphi %s1208_s26, %s1475_s26  }
   0xd   : > { %s43_s9 = sadd.s32 1, %s1157_s29  ;;  %s50_s10 = sadd.s32 1, %s1161_s30 }
   0xe   : > { %p44_p0 = scmp.ge.s32.totalorder %s43_s9, 2  ;;  %p183_p1 = scmp.ne.s32.totalorder %s1145_s0, %s1141_s27 }
   0xf   : > { %p184_p2 = scmp.eq.s32.totalorder %s838_s7, 3  ;;  %p189_p4 = scmp.ne.s32.totalorder %s1141_s27, %s1137_s26 }
  0x10   : > { %s1483_s9 = smov (%p44_p0, %s43_s9), 0  ;;  %s1485_s10 = smov (!%p44_p0, %s50_s10), %s1161_s30 }
  0x11   : > { %1468 = sst [smem:[#allocation9_spill]] %s1483_s9  ;;  %p1257_p3 = por %p184_p2, %p183_p1 }
  0x12   : > { %p52_p5 = scmp.ge.s32.totalorder %s1485_s10, 2  ;;  %p190_p6 = scmp.eq.s32.totalorder %s839_s8, 3 }
  0x13   : > { %p846_p7 = scmp.ge.s32.totalorder %s1165_s6, 1  ;;  %p272_p8 = scmp.lt.s32.totalorder %s1165_s6, 5 }
  0x14   : > { %s1487_s10 = smov (%p52_p5, %s1485_s10), 0  ;;  %p1267_p9 = por %p190_p6, %p189_p4 }
  0x15   : > { %1470 = sst [smem:[#allocation10_spill]] %s1487_s10  ;;  %p273_p10 = pnand %p846_p7, %p272_p8 }
  0x16   : > { %s168_s13 = ssub.s32 %s1161_s30, %s1487_s10  ;;  %s173_s14 = sadd.s32 1, %s1145_s0 }
  0x17   : > { %p171_p11 = scmp.eq.s32.totalorder %s168_s13, 0  ;;  %276 = sbr.rel (%p273_p10) target bundleno = 291 (0x123), region = 32 }
  0x18   : > { %s1467_s16 = sand.u32 (!%p273_p10), 1, %s1141_s27   ;;  %s328_s17 = sshra.s32 (!%p273_p10), %s1149_s28, 7 }
  0x19   : > { %s1275_s15 = scalar_select %p171_p11, %s1145_s0, %s173_s14  }
  0x1a   : > { %s847_s18 = sshll.u32 (!%p273_p10), %s1467_s16, 7  ;;  %s330_s19 = sadd.s32 (!%p273_p10), %s1153_s1, %s328_s17 }
  0x1b   : > { %s848_s20 = sshll.u32 (!%p273_p10), %s330_s19, 7  ;;  %s333_s21 = sand.u32 (!%p273_p10), 127, %s1149_s28 }
  0x1c   : > { %s854_s22 = sshll.u32 %s1153_s1, 4  ;;  %s334_s23 = sadd.s32 %s848_s20, %s333_s21 }
  0x1d   : > { %p375_p12 = scmp.lt.s32.totalorder %s854_s22, 31  ;;  %s335_s24 = sld [smem:[#allocation3 + %s334_s23]] }
  0x1e   : > { %s356_s25 = sld [smem:[#allocation4 + %s334_s23]]  ;;  %s1299_s8 = scalar_lea.vmem [#allocation5], %s847_s18 }
  0x1f   : > { %s1489_s22 = smov (!%p375_p12, %s854_s22), 31  ;;  %p856_p1 = scmp.ne.s32.totalorder %s1149_s28, 0 }
  0x20   : > { %s855_s7 = sshll.u32 %s1489_s22, 3 }
  0x21   : > { %s1287_s14 = scalar_lea.vmem %s1463_s4, %s855_s7 }
  0x23   : > { %p336_p13 = scmp.lt.s32.totalorder %s335_s24, 4 }
  0x24   : > { %s852_s10 = sshll.u32 %s356_s25, 4 }
  0x25   : > { %s1491_s24 = smov (!%p336_p13, %s335_s24), 4  ;;  %p358_p0 = scmp.lt.s32.totalorder %s852_s10, 31 }
  0x26   : > { %s927_s16 = sshll.u32 %s1491_s24, 6  ;;  %387 = sbr.rel (%p856_p1) target bundleno = 60 (0x3c), region = 36 }
  0x27   : > { %s1292_s9 = scalar_lea.vmem %s1461_s2, %s927_s16  ;;  %s1493_s10 = smov (!%p358_p0, %s852_s10), 31 }
  0x28   : > { %s853_s20 = sshll.u32 %s1493_s10, 2 }
  0x29   : > { %s1297_s22 = scalar_lea.vmem %s1462_s3, %s853_s20 }
  0x2b   : > { %v1169_v0 = vmov 0.0  }
  0x2c   : > { %388 = vst [vmem:[%s1299_s8] sm:$0xff] %v1169_v0 }
  0x2d   : > { %389 = vst [vmem:[%s1299_s8 + $0x8] sm:$0xff] %v1169_v0 }
  0x2e   : > { %390 = vst [vmem:[%s1299_s8 + $0x10] sm:$0xff] %v1169_v0 }
  0x2f   : > { %391 = vst [vmem:[%s1299_s8 + $0x18] sm:$0xff] %v1169_v0 }
  0x30   : > { %392 = vst [vmem:[%s1299_s8 + $0x20] sm:$0xff] %v1169_v0 }
  0x31   : > { %393 = vst [vmem:[%s1299_s8 + $0x28] sm:$0xff] %v1169_v0 }
  0x32   : > { %394 = vst [vmem:[%s1299_s8 + $0x30] sm:$0xff] %v1169_v0 }
  0x33   : > { %395 = vst [vmem:[%s1299_s8 + $0x38] sm:$0xff] %v1169_v0 }
  0x34   : > { %396 = vst [vmem:[%s1299_s8 + $0x40] sm:$0xff] %v1169_v0 }
  0x35   : > { %397 = vst [vmem:[%s1299_s8 + $0x48] sm:$0xff] %v1169_v0 }
  0x36   : > { %398 = vst [vmem:[%s1299_s8 + $0x50] sm:$0xff] %v1169_v0 }
  0x37   : > { %399 = vst [vmem:[%s1299_s8 + $0x58] sm:$0xff] %v1169_v0 }
  0x38   : > { %400 = vst [vmem:[%s1299_s8 + $0x60] sm:$0xff] %v1169_v0 }
  0x39   : > { %401 = vst [vmem:[%s1299_s8 + $0x68] sm:$0xff] %v1169_v0 }
  0x3a   : > { %402 = vst [vmem:[%s1299_s8 + $0x70] sm:$0xff] %v1169_v0 }
  0x3b   : > { %403 = vst [vmem:[%s1299_s8 + $0x78] sm:$0xff] %v1169_v0 }
  0x3c PF: > { %v943_v1 = vld [vmem:[%s1297_s22 + $0x38] sm:$0xff]  ;;  %v942_v2 = vld [vmem:[%s1297_s22 + $0x30] sm:$0xff]  ;;  %v941_v3 = vld [vmem:[%s1297_s22 + $0x28] sm:$0xff]  ;;  %p921_p2 = scmp.ne.s32.totalorder %s1149_s28, 1 }
  0x3d   : > { %548 = vmatpush.bf16.msra.mxu0 %v943_v1  ;;  %945 = vmatpush.bf16.msra.mxu1 %v943_v1  ;;  %v940_v4 = vld [vmem:[%s1297_s22 + $0x20] sm:$0xff]  ;;  %v939_v5 = vld [vmem:[%s1297_s22 + $0x18] sm:$0xff]  ;;  %v938_v6 = vld [vmem:[%s1297_s22 + $0x10] sm:$0xff] }
  0x3e   : > { %946 = vmatpush.bf16.msra.mxu2 %v943_v1  ;;  %947 = vmatpush.bf16.msra.mxu3 %v943_v1  ;;  %v937_v7 = vld [vmem:[%s1297_s22 + $0x8] sm:$0xff]  ;;  %v936_v8 = vld [vmem:[%s1297_s22] sm:$0xff]  ;;  %v930_v10 = vld [vmem:[%s1292_s9 + $0x10] sm:$0xff] }
  0x3f   : > { %v928_v9 = vld [vmem:[%s1292_s9] sm:$0xff]  ;;  %v934_v12 = vld [vmem:[%s1292_s9 + $0x30] sm:$0xff]  ;;  %v929_v13 = vld [vmem:[%s1292_s9 + $0x8] sm:$0xff] }
  0x40   : > { %v932_v11 = vld [vmem:[%s1292_s9 + $0x20] sm:$0xff]  ;;  %v931_v14 = vld [vmem:[%s1292_s9 + $0x18] sm:$0xff]  ;;  %v933_v15 = vld [vmem:[%s1292_s9 + $0x28] sm:$0xff] }
  0x41   : > { %549 = vmatpush.bf16.msra.mxu0 %v942_v2  ;;  %948 = vmatpush.bf16.msra.mxu1 %v942_v2  ;;  %v935_v16 = vld [vmem:[%s1292_s9 + $0x38] sm:$0xff]  ;;  %v404_v17 = vld [vmem:[%s1299_s8] sm:$0xff]  ;;  %v405_v25 = vld [vmem:[%s1299_s8 + $0x8] sm:$0xff] }
  0x42   : > { %949 = vmatpush.bf16.msra.mxu2 %v942_v2  ;;  %950 = vmatpush.bf16.msra.mxu3 %v942_v2  ;;  %v408_v18 = vld [vmem:[%s1299_s8 + $0x20] sm:$0xff]  ;;  %v409_v26 = vld [vmem:[%s1299_s8 + $0x28] sm:$0xff]  ;;  %v406_v37 = vld [vmem:[%s1299_s8 + $0x10] sm:$0xff] }
  0x43   : > { %v412_v23 = vld [vmem:[%s1299_s8 + $0x40] sm:$0xff]  ;;  %v413_v35 = vld [vmem:[%s1299_s8 + $0x48] sm:$0xff]  ;;  %v410_v38 = vld [vmem:[%s1299_s8 + $0x30] sm:$0xff] }
  0x44   : > { %v416_v24 = vld [vmem:[%s1299_s8 + $0x60] sm:$0xff]  ;;  %v417_v36 = vld [vmem:[%s1299_s8 + $0x68] sm:$0xff]  ;;  %v414_v47 = vld [vmem:[%s1299_s8 + $0x50] sm:$0xff] }
  0x45   : > { %550 = vmatpush.bf16.msra.mxu0 %v941_v3  ;;  %951 = vmatpush.bf16.msra.mxu1 %v941_v3  ;;  %v418_v48 = vld [vmem:[%s1299_s8 + $0x70] sm:$0xff]  ;;  %v407_v49 = vld [vmem:[%s1299_s8 + $0x18] sm:$0xff] }
  0x46   : > { %952 = vmatpush.bf16.msra.mxu2 %v941_v3  ;;  %953 = vmatpush.bf16.msra.mxu3 %v941_v3  ;;  %v411_v50 = vld [vmem:[%s1299_s8 + $0x38] sm:$0xff] }
  0x47   : > { %v415_v59 = vld [vmem:[%s1299_s8 + $0x58] sm:$0xff] }
  0x48   : > { %v419_v60 = vld [vmem:[%s1299_s8 + $0x78] sm:$0xff] }
  0x49   : > { %551 = vmatpush.bf16.msra.mxu0 %v940_v4  ;;  %954 = vmatpush.bf16.msra.mxu1 %v940_v4 }
  0x4a   : > { %955 = vmatpush.bf16.msra.mxu2 %v940_v4  ;;  %956 = vmatpush.bf16.msra.mxu3 %v940_v4 }
  0x4d   : > { %552 = vmatpush.bf16.msra.mxu0 %v939_v5  ;;  %957 = vmatpush.bf16.msra.mxu1 %v939_v5 }
  0x4e   : > { %958 = vmatpush.bf16.msra.mxu2 %v939_v5  ;;  %959 = vmatpush.bf16.msra.mxu3 %v939_v5 }
  0x51   : > { %553 = vmatpush.bf16.msra.mxu0 %v938_v6  ;;  %960 = vmatpush.bf16.msra.mxu1 %v938_v6 }
  0x52   : > { %961 = vmatpush.bf16.msra.mxu2 %v938_v6  ;;  %962 = vmatpush.bf16.msra.mxu3 %v938_v6 }
  0x55   : > { %554 = vmatpush.bf16.msra.mxu0 %v937_v7  ;;  %963 = vmatpush.bf16.msra.mxu1 %v937_v7 }
  0x56   : > { %964 = vmatpush.bf16.msra.mxu2 %v937_v7  ;;  %965 = vmatpush.bf16.msra.mxu3 %v937_v7 }
  0x59   : > { %555 = vmatpush.bf16.msra.mxu0 %v936_v8  ;;  %966 = vmatpush.bf16.msra.mxu1 %v936_v8 }
  0x5a   : > { %967 = vmatpush.bf16.msra.mxu2 %v936_v8  ;;  %968 = vmatpush.bf16.msra.mxu3 %v936_v8 }
  0x5c   : > { %556 = vmatmul.bf16.vlgmr.msra.gmra.mxu0 %v928_v9  ;;  %566 = vmatmul.bf16.vlgmr.msra.gmra.mxu1 %v930_v10 }
  0x5d   : > { %576 = vmatmul.bf16.vlgmr.msra.gmra.mxu2 %v932_v11  ;;  %586 = vmatmul.bf16.vlgmr.msra.gmra.mxu3 %v934_v12 }
  0x6c   : > { %561 = vmatmul.bf16.gmra.mxu0 %v929_v13  ;;  %571 = vmatmul.bf16.gmra.mxu1 %v931_v14 }
  0x6d   : > { %581 = vmatmul.bf16.gmra.mxu2 %v933_v15  ;;  %591 = vmatmul.bf16.gmra.mxu3 %v935_v16 }
  0xd9   : > { %v557_v19 = vpop.f32.mrf.mxu0  ;;  %v567_v20 = vpop.f32.mrf.mxu1 }
  0xda   : > { %v597_v21 = vadd.f32 %v557_v19, %v404_v17  ;;  %v601_v22 = vadd.f32 %v567_v20, %v408_v18 }
  0xdc   : > { %613 = vst [vmem:[%s1299_s8] sm:$0xff] %v597_v21 }
  0xdd   : > { %617 = vst [vmem:[%s1299_s8 + $0x20] sm:$0xff] %v601_v22 }
  0xe0   : > { %v577_v27 = vpop.f32.mrf.mxu2  ;;  %v587_v28 = vpop.f32.mrf.mxu3 }
  0xe1   : > { %v605_v29 = vadd.f32 %v577_v27, %v412_v23  ;;  %v609_v30 = vadd.f32 %v587_v28, %v416_v24  ;;  %v559_v31 = vpop.f32.mrf.mxu0  ;;  %v569_v32 = vpop.f32.mrf.mxu1 }
  0xe2   : > { %v598_v33 = vadd.f32 %v559_v31, %v405_v25  ;;  %v602_v34 = vadd.f32 %v569_v32, %v409_v26 }
  0xe3   : > { %621 = vst [vmem:[%s1299_s8 + $0x40] sm:$0xff] %v605_v29 }
  0xe4   : > { %625 = vst [vmem:[%s1299_s8 + $0x60] sm:$0xff] %v609_v30 }
  0xe5   : > { %614 = vst [vmem:[%s1299_s8 + $0x8] sm:$0xff] %v598_v33 }
  0xe6   : > { %618 = vst [vmem:[%s1299_s8 + $0x28] sm:$0xff] %v602_v34 }
  0xe8   : > { %v579_v39 = vpop.f32.mrf.mxu2  ;;  %v589_v40 = vpop.f32.mrf.mxu3 }
  0xe9   : > { %v606_v41 = vadd.f32 %v579_v39, %v413_v35  ;;  %v610_v42 = vadd.f32 %v589_v40, %v417_v36  ;;  %v562_v43 = vpop.f32.mrf.mxu0  ;;  %v572_v44 = vpop.f32.mrf.mxu1 }
  0xea   : > { %v599_v45 = vadd.f32 %v562_v43, %v406_v37  ;;  %v603_v46 = vadd.f32 %v572_v44, %v410_v38 }
  0xeb   : > { %622 = vst [vmem:[%s1299_s8 + $0x48] sm:$0xff] %v606_v41 }
  0xec   : > { %626 = vst [vmem:[%s1299_s8 + $0x68] sm:$0xff] %v610_v42 }
  0xed   : > { %615 = vst [vmem:[%s1299_s8 + $0x10] sm:$0xff] %v599_v45 }
  0xee   : > { %619 = vst [vmem:[%s1299_s8 + $0x30] sm:$0xff] %v603_v46 }
  0xf0   : > { %v582_v51 = vpop.f32.mrf.mxu2  ;;  %v592_v52 = vpop.f32.mrf.mxu3 }
  0xf1   : > { %v607_v53 = vadd.f32 %v582_v51, %v414_v47  ;;  %v611_v54 = vadd.f32 %v592_v52, %v418_v48  ;;  %v564_v55 = vpop.f32.mrf.mxu0  ;;  %v574_v56 = vpop.f32.mrf.mxu1 }
  0xf2   : > { %v600_v57 = vadd.f32 %v564_v55, %v407_v49  ;;  %v604_v58 = vadd.f32 %v574_v56, %v411_v50 }
  0xf3   : > { %623 = vst [vmem:[%s1299_s8 + $0x50] sm:$0xff] %v607_v53 }
  0xf4   : > { %627 = vst [vmem:[%s1299_s8 + $0x70] sm:$0xff] %v611_v54 }
  0xf5   : > { %616 = vst [vmem:[%s1299_s8 + $0x18] sm:$0xff] %v600_v57 }
  0xf6   : > { %620 = vst [vmem:[%s1299_s8 + $0x38] sm:$0xff] %v604_v58 }
  0xf8   : > { %v584_v61 = vpop.f32.mrf.mxu2  ;;  %v594_v62 = vpop.f32.mrf.mxu3  ;;  %632 = sbr.rel (%p921_p2) target bundleno = 275 (0x113), region = 40 }
  0xf9   : > { %v608_v63 = vadd.f32 %v584_v61, %v415_v59  ;;  %v612_v0 = vadd.f32 %v594_v62, %v419_v60 }
  0xfb   : > { %624 = vst [vmem:[%s1299_s8 + $0x58] sm:$0xff] %v608_v63 }
  0xfc   : > { %628 = vst [vmem:[%s1299_s8 + $0x78] sm:$0xff] %v612_v0 }
  0xfd   : > { %v633_v1 = vld [vmem:[%s1287_s14] sm:$0xff]  ;;  %v634_v3 = vld [vmem:[%s1287_s14 + $0x8] sm:$0xff]  ;;  %v635_v6 = vld [vmem:[%s1287_s14 + $0x10] sm:$0xff] }
  0xfe   : > { %v649_v2 = vld [vmem:[%s1299_s8] sm:$0xff]  ;;  %v650_v5 = vld [vmem:[%s1299_s8 + $0x8] sm:$0xff]  ;;  %v651_v7 = vld [vmem:[%s1299_s8 + $0x10] sm:$0xff] }
  0xff   : > { %v665_v4 = vmul.f32 0.33333334, %v649_v2  ;;  %v666_v8 = vmul.f32 0.33333334, %v650_v5  ;;  %v667_v9 = vmul.f32 0.33333334, %v651_v7 }
 0x100   : > { %v636_v10 = vld [vmem:[%s1287_s14 + $0x18] sm:$0xff]  ;;  %v637_v14 = vld [vmem:[%s1287_s14 + $0x20] sm:$0xff]  ;;  %v638_v16 = vld [vmem:[%s1287_s14 + $0x28] sm:$0xff] }
 0x101   : > { %v652_v11 = vld [vmem:[%s1299_s8 + $0x18] sm:$0xff]  ;;  %v681_v12 = vadd.f32 %v665_v4, %v633_v1  ;;  %v653_v15 = vld [vmem:[%s1299_s8 + $0x20] sm:$0xff]  ;;  %v682_v17 = vadd.f32 %v666_v8, %v634_v3  ;;  %v683_v18 = vadd.f32 %v667_v9, %v635_v6  ;;  %v654_v20 = vld [vmem:[%s1299_s8 + $0x28] sm:$0xff] }
 0x102   : > { %v668_v13 = vmul.f32 0.33333334, %v652_v11  ;;  %v669_v19 = vmul.f32 0.33333334, %v653_v15  ;;  %v639_v21 = vld [vmem:[%s1287_s14 + $0x30] sm:$0xff]  ;;  %v640_v26 = vld [vmem:[%s1287_s14 + $0x38] sm:$0xff] }
 0x103   : > { %v655_v22 = vld [vmem:[%s1299_s8 + $0x30] sm:$0xff]  ;;  %697 = vst [vmem:[%s1299_s8] sm:$0xff] %v681_v12  ;;  %v670_v24 = vmul.f32 0.33333334, %v654_v20  ;;  %v656_v27 = vld [vmem:[%s1299_s8 + $0x38] sm:$0xff]  ;;  %v641_v30 = vld [vmem:[%s1287_s14 + $0x40] sm:$0xff] }
 0x104   : > { %v684_v23 = vadd.f32 %v668_v13, %v636_v10  ;;  %v671_v25 = vmul.f32 0.33333334, %v655_v22  ;;  %698 = vst [vmem:[%s1299_s8 + $0x8] sm:$0xff] %v682_v17  ;;  %v685_v28 = vadd.f32 %v669_v19, %v637_v14  ;;  %v672_v29 = vmul.f32 0.33333334, %v656_v27  ;;  %v657_v31 = vld [vmem:[%s1299_s8 + $0x40] sm:$0xff] }
 0x105   : > { %699 = vst [vmem:[%s1299_s8 + $0x10] sm:$0xff] %v683_v18  ;;  %v686_v32 = vadd.f32 %v670_v24, %v638_v16  ;;  %v673_v34 = vmul.f32 0.33333334, %v657_v31  ;;  %v642_v35 = vld [vmem:[%s1287_s14 + $0x48] sm:$0xff]  ;;  %v659_v37 = vld [vmem:[%s1299_s8 + $0x50] sm:$0xff]  ;;  %v644_v43 = vld [vmem:[%s1287_s14 + $0x58] sm:$0xff] }
 0x106   : > { %v687_v33 = vadd.f32 %v671_v25, %v639_v21  ;;  %v658_v36 = vld [vmem:[%s1299_s8 + $0x48] sm:$0xff]  ;;  %700 = vst [vmem:[%s1299_s8 + $0x18] sm:$0xff] %v684_v23  ;;  %v688_v38 = vadd.f32 %v672_v29, %v640_v26  ;;  %v643_v40 = vld [vmem:[%s1287_s14 + $0x50] sm:$0xff]  ;;  %v675_v41 = vmul.f32 0.33333334, %v659_v37  ;;  %v660_v44 = vld [vmem:[%s1299_s8 + $0x58] sm:$0xff] }
 0x107   : > { %v674_v39 = vmul.f32 0.33333334, %v658_v36  ;;  %701 = vst [vmem:[%s1299_s8 + $0x20] sm:$0xff] %v685_v28  ;;  %v689_v42 = vadd.f32 %v673_v34, %v641_v30  ;;  %v661_v45 = vld [vmem:[%s1299_s8 + $0x60] sm:$0xff]  ;;  %v676_v47 = vmul.f32 0.33333334, %v660_v44 }
 0x108   : > { %702 = vst [vmem:[%s1299_s8 + $0x28] sm:$0xff] %v686_v32  ;;  %v645_v48 = vld [vmem:[%s1287_s14 + $0x60] sm:$0xff]  ;;  %v677_v49 = vmul.f32 0.33333334, %v661_v45  ;;  %v691_v50 = vadd.f32 %v675_v41, %v643_v40  ;;  %v646_v51 = vld [vmem:[%s1287_s14 + $0x68] sm:$0xff]  ;;  %v663_v53 = vld [vmem:[%s1299_s8 + $0x70] sm:$0xff] }
 0x109   : > { %v690_v46 = vadd.f32 %v674_v39, %v642_v35  ;;  %703 = vst [vmem:[%s1299_s8 + $0x30] sm:$0xff] %v687_v33  ;;  %v662_v52 = vld [vmem:[%s1299_s8 + $0x68] sm:$0xff]  ;;  %v692_v54 = vadd.f32 %v676_v47, %v644_v43  ;;  %v647_v56 = vld [vmem:[%s1287_s14 + $0x70] sm:$0xff]  ;;  %v679_v57 = vmul.f32 0.33333334, %v663_v53  ;;  %v648_v59 = vld [vmem:[%s1287_s14 + $0x78] sm:$0xff] }
 0x10a   : > { %704 = vst [vmem:[%s1299_s8 + $0x38] sm:$0xff] %v688_v38  ;;  %v678_v55 = vmul.f32 0.33333334, %v662_v52  ;;  %v693_v58 = vadd.f32 %v677_v49, %v645_v48  ;;  %v664_v60 = vld [vmem:[%s1299_s8 + $0x78] sm:$0xff] }
 0x10b   : > { %705 = vst [vmem:[%s1299_s8 + $0x40] sm:$0xff] %v689_v42  ;;  %v680_v62 = vmul.f32 0.33333334, %v664_v60  ;;  %v695_v63 = vadd.f32 %v679_v57, %v647_v56 }
 0x10c   : > { %706 = vst [vmem:[%s1299_s8 + $0x48] sm:$0xff] %v690_v46  ;;  %v694_v61 = vadd.f32 %v678_v55, %v646_v51 }
 0x10d   : > { %707 = vst [vmem:[%s1299_s8 + $0x50] sm:$0xff] %v691_v50  ;;  %v696_v0 = vadd.f32 %v680_v62, %v648_v59 }
 0x10e   : > { %708 = vst [vmem:[%s1299_s8 + $0x58] sm:$0xff] %v692_v54 }
 0x10f   : > { %709 = vst [vmem:[%s1299_s8 + $0x60] sm:$0xff] %v693_v58 }
 0x110   : > { %710 = vst [vmem:[%s1299_s8 + $0x68] sm:$0xff] %v694_v61 }
 0x111   : > { %711 = vst [vmem:[%s1299_s8 + $0x70] sm:$0xff] %v695_v63 }
 0x112   : > { %712 = vst [vmem:[%s1299_s8 + $0x78] sm:$0xff] %v696_v0 }
 0x113 PF: > { %s944_s28 = sshll.u32 %s1153_s1, 7  ;;  %s727_s18 = sshll.u32 %s1299_s8, 4  ;;  %s728_s18 = int_to_ptr.vmem [resolvable:$true] %s727_s18 }
 0x114   : > { %s726_s16 = scalar_lea.hbm %s1464_s5, %s944_s28  ;;  %s1472_s25 = sand.u32 1, %s1141_s27  }
 0x115   : > { %s729_s24 = sshll.u32 %s726_s16, 4  ;;  %s714_s7 = scalar_lea.sflag [#allocation6], %s1472_s25  ;;  %s730_s24 = int_to_ptr.hbm [resolvable:$true] %s729_s24 }
 0x116   : > { %s1083_s13 = sshra.s32 %s730_s24, 4  ;;  %s1089_s1 = scalar_lea.hbm %s1464_s5, 256  ;;  %s1084_s13 = int_to_ptr.hbm [resolvable:$true] %s1083_s13 }
 0x117   : > { %s1085_s14 = scalar_lea.hbm %s1084_s13, 128  ;;  %p1090_p7 = scmp.lt.s32.totalorder %s1084_s13, %s1464_s5 }
 0x118   : > { %p1086_p4 = scmp.ne.s32.totalorder %s1084_s13, %s1085_s14  ;;  %p1091_p8 = scmp.lt.s32.totalorder %s1089_s1, %s1085_s14 }
 0x11a   : > { %p1087_p5 = pnand %p1086_p4, %p1257_p3  ;;  %p1092_p10 = por %p1091_p8, %p1090_p7 }
 0x11c   : > { %p1088_p6 = pneg %p1087_p5 }
 0x11e   : > { %p1093_p11 = pnand %p1092_p10, %p1088_p6 }
 0x120   : > { %1096 = shalt.err (!%p1093_p11)
}
 0x121   : > { %s1170_s23 = smov 128   ;;  %s1171_s22 = smov 8  }
 0x122   : > { %969 = dma.vmem_to_hbm [thread:$0]  (%p1257_p3), %s728_s18, 2048, %s730_s24, %s714_s7, %s1170_s23, %s1170_s23, %s1171_s22  }
 0x123 PF: > { %p975_p12 = scmp.ge.s32.totalorder %s1165_s6, 2  ;;  %s744_s8 = sand.u32 1, %s1137_s26  }
 0x124   : > { %s745_s28 = scalar_lea.sflag [#allocation6], %s744_s8 }
 0x125   : > { %p972_p13 = pnand %p975_p12, %p1267_p9 }
 0x127   : > { %p973_p0 = pneg %p972_p13 }
 0x129   : > { %1132 = dma.done.wait (%p973_p0), %s745_s28, 2048  }
 0x12a   : > { %1134 = vsyncadd (%p973_p0), %s745_s28, 4294965248  ;;  %s31_s6 = sadd.s32 1, %s1165_s6   ;;  %s1473_s11 = sld [smem:[#allocation9_spill]] }
 0x12b   : > { %p28_p1 = scmp.ge.s32.totalorder %s31_s6, 6   ;;  %s1474_s9 = sld [smem:[#allocation10_spill]] }
 0x12c   : > { %s1475_s26 = smov %s1141_s27  ;;  %s1476_s27 = smov %s1145_s0 }
 0x12d   : > { %s1477_s0 = smov %s1275_s15  ;;  %s1478_s28 = smov %s1157_s29 }
 0x12e   : > { %s1479_s1 = smov %s1161_s30  ;;  %30 = sbr.rel (!%p28_p1) target bundleno = 12 (0xc), region = 81 }
 0x130   : > { %s1480_s29 = smov %s1473_s11 }
 0x131   : > { %s1481_s30 = smov %s1474_s9 }
 0x133   :  { %751 = vsyncpa [#allocation6], 1 }
 0x134   :  { %753 = vsyncpa [#allocation6 + $0x1], 1 }

// kernel: _lgc_prop_padded.5
= control target key start
LH: loop header
LB: loop body
LE: loop exit
PB: predicated region body
PF: predicated region fallthrough
CT: control target
= control target key end

     0   :  { %s1349_s27 = smov [#allocation3]   ;;  %s1350_s28 = smov [#allocation4]   ;;  %s1666_s0 = inlined_call_operand.vmem [shape: s32[2,2], index: 0, kind: input, shape index: {}]   ;;  %s1667_s2 = inlined_call_operand.hbm [shape: bf16[5,128,128], index: 2, kind: input, shape index: {}]   ;;  %s1668_s3 = inlined_call_operand.vmem [shape: bf16[256,128], index: 3, kind: input, shape index: {}]   ;;  %s1669_s4 = inlined_call_operand.vmem [shape: f32[256,128], index: 4, kind: input, shape index: {}]   ;;  %s1670_s5 = inlined_call_operand.vmem [shape: bf16[256,128], index: 5, kind: output, shape index: {0}]   ;;  %s1671_s6 = inlined_call_operand.vmem [shape: f32[256,128], index: 6, kind: output, shape index: {1}]   ;;  %s1672_s1 = inlined_call_operand.vmem [shape: s32[2,2], index: 1, kind: input, shape index: {}]  }
   0x1   :  { %s13_s23 = sshll.u32 %s1666_s0, 4  ;;  %s18_s26 = sshll.u32 %s1672_s1, 4  ;;  %s14_s23 = int_to_ptr.vmem [resolvable:$true] %s13_s23  ;;  %s19_s26 = int_to_ptr.vmem [resolvable:$true] %s18_s26 }
   0x2   :  { %16 = dma.vmem_to_smem %s14_s23, 32, %s1349_s27, [#allocation2] }
   0x3   :  { %21 = dma.vmem_to_smem %s19_s26, 32, %s1350_s28, [#allocation2] }
   0x4   :  { %1311 = dma.done.wait [#allocation2], 64 }
   0x5   :  { %1312 = vsyncadd [#allocation2], 4294967232 }
   0x6   :  { %24 = sfence }
   0x7   :  { %25 = vsyncpa [#allocation6], 0 }
   0x8   :  { %27 = vsyncpa [#allocation6 + $0x1], 0  ;;  %s1395_s29 = smov 0   ;;  %s1397_s30 = smov 0  }
   0x9   :  { %s1399_s0 = smov 0   ;;  %s1401_s7 = smov 0  }
   0xa   :  { %s1403_s1 = smov 0   ;;  %s1405_s8 = smov 0  }
   0xb   :  { %s1407_s9 = smov 0   ;;  %s1409_s10 = smov 0  }
   0xc LB: > { %s45_s11 = sadd.s32 1, %s1339_s8  ;;  %s52_s12 = sadd.s32 1, %s1343_s9  ;;  %s1347_s10 = sphi %s1409_s10, %s33_s10   ;;  %s1343_s9 = sphi %s1407_s9, %s1688_s9   ;;  %s1339_s8 = sphi %s1405_s8, %s1687_s8   ;;  %s1335_s1 = sphi %s1403_s1, %s1686_s1   ;;  %s1331_s7 = sphi %s1401_s7, %s1685_s7   ;;  %s1327_s0 = sphi %s1399_s0, %s1684_s0   ;;  %s1323_s30 = sphi %s1397_s30, %s1683_s30   ;;  %s1319_s29 = sphi %s1395_s29, %s1682_s29  }
   0xd   : > { %p46_p0 = scmp.ge.s32.totalorder %s45_s11, 2  ;;  %s56_s13 = sshra.s32 %s1339_s8, 7 }
   0xe   : > { %s58_s14 = sadd.s32 %s1343_s9, %s56_s13  ;;  %s61_s15 = sand.u32 127, %s1339_s8 }
   0xf   : > { %s1690_s11 = smov (%p46_p0, %s45_s11), 0  ;;  %s1692_s12 = smov (!%p46_p0, %s52_s12), %s1343_s9 }
  0x10   : > { %1675 = sst [smem:[#allocation11_spill]] %s1690_s11  ;;  %p54_p1 = scmp.ge.s32.totalorder %s1692_s12, 2 }
  0x11   : > { %s968_s16 = sshll.u32 %s58_s14, 7  ;;  %s966_s17 = sadd.s32 4294967295, %s1347_s10  }
  0x12   : > { %s64_s18 = sshra.s32 %s1690_s11, 7  ;;  %s1694_s12 = smov (%p54_p1, %s1692_s12), 0 }
  0x13   : > { %1676 = sst [smem:[#allocation12_spill]] %s1694_s12  ;;  %s62_s19 = sadd.s32 %s968_s16, %s61_s15 }
  0x14   : > { %s69_s20 = sand.u32 127, %s1690_s11  ;;  %s63_s21 = sld [smem:[#allocation3 + %s62_s19]] }
  0x15   : > { %s66_s22 = sadd.s32 %s64_s18, %s1694_s12  ;;  %p82_p2 = scmp.ne.s32.totalorder %s1327_s0, %s1323_s30 }
  0x16   : > { %s969_s23 = sshll.u32 %s66_s22, 7  ;;  %p88_p3 = scmp.ne.s32.totalorder %s1323_s30, %s1319_s29 }
  0x17   : > { %s70_s24 = sadd.s32 %s969_s23, %s69_s20  ;;  %p83_p4 = scmp.eq.s32.totalorder %s1347_s10, 0 }
  0x18   : > { %s71_s25 = sld [smem:[#allocation3 + %s70_s24]]  ;;  %p89_p5 = scmp.eq.s32.totalorder %s966_s17, 0 }
  0x19   : > { %s240_s27 = sand.u32 1, %s1327_s0   ;;  %p84_p7 = por %p83_p4, %p82_p2 }
  0x1a   : > { %p1454_p6 = por %p89_p5, %p88_p3  ;;  %s75_s28 = sadd.s32 1, %s1327_s0 }
  0x1b   : > { %p1155_p8 = scmp.lt.s32.totalorder %s1347_s10, 4  ;;  %s974_s14 = sshll.u32 %s240_s27, 6 }
  0x1c   : > { %s1145_s29 = scalar_select %p84_p7, [#allocation3], [#allocation7] }
  0x1d   : > { %p1461_p10 = pnand %p1155_p8, %p84_p7  ;;  %s1696_s19 = smov (!%p84_p7, %s62_s19), 0 }
  0x1e   : > { %s72_s13 = ssub.s32 %s63_s21, %s71_s25  ;;  %s1698_s29 = smov (!%p1155_p8, %s1145_s29), [#allocation8] }
  0x1f   : > { %p73_p9 = scmp.eq.s32.totalorder %s72_s13, 0  ;;  %s1700_s19 = smov (!%p1155_p8, %s1696_s19), 0 }
  0x20   : > { %s252_s17 = sld [smem:[%s1698_s29 + %s1700_s19]]  ;;  %p978_p11 = scmp.ge.s32.totalorder %s1347_s10, 1 }
  0x21   : > { %s1466_s16 = scalar_select %p73_p9, %s1327_s0, %s75_s28  }
  0x22   : > { %p308_p12 = scmp.lt.s32.totalorder %s1347_s10, 5  ;;  %s244_s18 = scalar_lea.vmem [#allocation5], %s974_s14 }
  0x23   : > { %s260_s20 = sshll.u32 %s244_s18, 4  ;;  %s241_s13 = scalar_lea.sflag [#allocation6], %s240_s27  ;;  %s261_s20 = int_to_ptr.vmem [resolvable:$true] %s260_s20 }
  0x24   : > { %p1470_p13 = pnand %p978_p11, %p308_p12  ;;  %p1253_p1 = pneg %p1461_p10 }
  0x26   : > { %s1057_s22 = sshll.u32 %s252_s17, 6  ;;  %s1256_s17 = scalar_lea.hbm %s1667_s2, 320 }
  0x27   : > { %s257_s25 = scalar_lea.hbm %s1667_s2, %s1057_s22 }
  0x28   : > { %s258_s28 = sshll.u32 %s257_s25, 4  ;;  %s259_s28 = int_to_ptr.hbm [resolvable:$true] %s258_s28 }
  0x29   : > { %s1249_s12 = sshra.s32 %s259_s28, 4  ;;  %s1250_s12 = int_to_ptr.hbm [resolvable:$true] %s1249_s12 }
  0x2a   : > { %s1251_s19 = scalar_lea.hbm %s1250_s12, 64  ;;  %p1257_p4 = scmp.lt.s32.totalorder %s1250_s12, %s1667_s2 }
  0x2b   : > { %p1252_p0 = scmp.ne.s32.totalorder %s1250_s12, %s1251_s19  ;;  %p1258_p5 = scmp.lt.s32.totalorder %s1256_s17, %s1251_s19 }
  0x2d   : > { %p1254_p2 = pnand %p1253_p1, %p1252_p0  ;;  %p1259_p7 = por %p1258_p5, %p1257_p4 }
  0x2f   : > { %p1255_p3 = pneg %p1254_p2 }
  0x31   : > { %p1260_p8 = pnand %p1259_p7, %p1255_p3 }
  0x33   : > { %1263 = shalt.err (!%p1260_p8)
}
  0x34   : > { %s1351_s27 = smov 64   ;;  %s1352_s22 = smov 4  }
  0x35   : > { %1154 = dma.hbm_to_vmem [thread:$0]  (!%p1461_p10), %s259_s28, 1024, %s261_s20, %s241_s13, %s1351_s27, %s1351_s27, %s1352_s22  }
  0x36   : > { %312 = sbr.rel (%p1470_p13) target bundleno = 313 (0x139), region = 32  ;;  %s314_s23 = sand.u32 (!%p1470_p13), 1, %s1323_s30  }
  0x37   : > { %s979_s24 = sshll.u32 (!%p1470_p13), %s314_s23, 6  ;;  %s315_s25 = scalar_lea.sflag (!%p1470_p13), [#allocation6], %s314_s23 }
  0x38   : > { %s1490_s14 = scalar_lea.vmem (!%p1470_p13), [#allocation5], %s979_s24 }
  0x3b   : > { %1314 = dma.done.wait (%p1454_p6), %s315_s25, 1024  }
  0x3c   : > { %1316 = vsyncadd (%p1454_p6), %s315_s25, 4294966272  ;;  %s387_s11 = sshra.s32 %s1331_s7, 7  ;;  %s392_s12 = sand.u32 127, %s1331_s7 }
  0x3d   : > { %s389_s15 = sadd.s32 %s1335_s1, %s387_s11  ;;  %s983_s20 = sshll.u32 %s1335_s1, 4 }
  0x3e   : > { %s980_s21 = sshll.u32 %s389_s15, 7  ;;  %p413_p9 = scmp.lt.s32.totalorder %s983_s20, 31 }
  0x3f   : > { %s393_s28 = sadd.s32 %s980_s21, %s392_s12  ;;  %p989_p10 = scmp.ne.s32.totalorder %s1331_s7, 0 }
  0x40   : > { %s394_s13 = sld [smem:[#allocation4 + %s393_s28]]  ;;  %s1702_s20 = smov (!%p413_p9, %s983_s20), 31 }
  0x41   : > { %s984_s19 = sshll.u32 %s1702_s20, 3  ;;  %s986_s29 = sshll.u32 %s1702_s20, 2 }
  0x42   : > { %s1503_s26 = scalar_lea.vmem %s1669_s4, %s984_s19  ;;  %s1508_s23 = scalar_lea.vmem %s1670_s5, %s986_s29 }
  0x43   : > { %s1513_s1 = scalar_lea.vmem %s1671_s6, %s984_s19 }
  0x46   : > { %s981_s11 = sshll.u32 %s394_s13, 4 }
  0x47   : > { %p396_p6 = scmp.lt.s32.totalorder %s981_s11, 31  ;;  %442 = sbr.rel (%p989_p10) target bundleno = 93 (0x5d), region = 40 }
  0x49   : > { %s1704_s11 = smov (!%p396_p6, %s981_s11), 31 }
  0x4a   : > { %s982_s12 = sshll.u32 %s1704_s11, 2 }
  0x4b   : > { %s1518_s21 = scalar_lea.vmem %s1668_s3, %s982_s12 }
  0x4c   : > { %v1353_v0 = vmov 0.0  }
  0x4d   : > { %443 = vst [vmem:[%s1513_s1] sm:$0xff] %v1353_v0 }
  0x4e   : > { %444 = vst [vmem:[%s1513_s1 + $0x8] sm:$0xff] %v1353_v0 }
  0x4f   : > { %445 = vst [vmem:[%s1513_s1 + $0x10] sm:$0xff] %v1353_v0 }
  0x50   : > { %446 = vst [vmem:[%s1513_s1 + $0x18] sm:$0xff] %v1353_v0 }
  0x51   : > { %447 = vst [vmem:[%s1513_s1 + $0x20] sm:$0xff] %v1353_v0 }
  0x52   : > { %448 = vst [vmem:[%s1513_s1 + $0x28] sm:$0xff] %v1353_v0 }
  0x53   : > { %449 = vst [vmem:[%s1513_s1 + $0x30] sm:$0xff] %v1353_v0 }
  0x54   : > { %450 = vst [vmem:[%s1513_s1 + $0x38] sm:$0xff] %v1353_v0 }
  0x55   : > { %451 = vst [vmem:[%s1513_s1 + $0x40] sm:$0xff] %v1353_v0 }
  0x56   : > { %452 = vst [vmem:[%s1513_s1 + $0x48] sm:$0xff] %v1353_v0 }
  0x57   : > { %453 = vst [vmem:[%s1513_s1 + $0x50] sm:$0xff] %v1353_v0 }
  0x58   : > { %454 = vst [vmem:[%s1513_s1 + $0x58] sm:$0xff] %v1353_v0 }
  0x59   : > { %455 = vst [vmem:[%s1513_s1 + $0x60] sm:$0xff] %v1353_v0 }
  0x5a   : > { %456 = vst [vmem:[%s1513_s1 + $0x68] sm:$0xff] %v1353_v0 }
  0x5b   : > { %457 = vst [vmem:[%s1513_s1 + $0x70] sm:$0xff] %v1353_v0 }
  0x5c   : > { %458 = vst [vmem:[%s1513_s1 + $0x78] sm:$0xff] %v1353_v0 }
  0x5d PF: > { %v1073_v1 = vld [vmem:[%s1518_s21 + $0x38] sm:$0xff]  ;;  %v1072_v2 = vld [vmem:[%s1518_s21 + $0x30] sm:$0xff]  ;;  %v1071_v3 = vld [vmem:[%s1518_s21 + $0x28] sm:$0xff]  ;;  %p1054_p11 = scmp.ne.s32.totalorder %s1331_s7, 1 }
  0x5e   : > { %603 = vmatpush.bf16.msra.mxu0 %v1073_v1  ;;  %1121 = vmatpush.bf16.msra.mxu1 %v1073_v1  ;;  %v1070_v4 = vld [vmem:[%s1518_s21 + $0x20] sm:$0xff]  ;;  %v1069_v5 = vld [vmem:[%s1518_s21 + $0x18] sm:$0xff]  ;;  %v1068_v6 = vld [vmem:[%s1518_s21 + $0x10] sm:$0xff] }
  0x5f   : > { %1122 = vmatpush.bf16.msra.mxu2 %v1073_v1  ;;  %1123 = vmatpush.bf16.msra.mxu3 %v1073_v1  ;;  %v1067_v7 = vld [vmem:[%s1518_s21 + $0x8] sm:$0xff]  ;;  %v1066_v8 = vld [vmem:[%s1518_s21] sm:$0xff]  ;;  %v1060_v10 = vld [vmem:[%s1490_s14 + $0x10] sm:$0xff] }
  0x60   : > { %v1058_v9 = vld [vmem:[%s1490_s14] sm:$0xff]  ;;  %v1064_v12 = vld [vmem:[%s1490_s14 + $0x30] sm:$0xff]  ;;  %v1059_v13 = vld [vmem:[%s1490_s14 + $0x8] sm:$0xff] }
  0x61   : > { %v1062_v11 = vld [vmem:[%s1490_s14 + $0x20] sm:$0xff]  ;;  %v1061_v14 = vld [vmem:[%s1490_s14 + $0x18] sm:$0xff]  ;;  %v1063_v15 = vld [vmem:[%s1490_s14 + $0x28] sm:$0xff] }
  0x62   : > { %604 = vmatpush.bf16.msra.mxu0 %v1072_v2  ;;  %1124 = vmatpush.bf16.msra.mxu1 %v1072_v2  ;;  %v1065_v16 = vld [vmem:[%s1490_s14 + $0x38] sm:$0xff]  ;;  %v459_v17 = vld [vmem:[%s1513_s1] sm:$0xff]  ;;  %v460_v25 = vld [vmem:[%s1513_s1 + $0x8] sm:$0xff] }
  0x63   : > { %1125 = vmatpush.bf16.msra.mxu2 %v1072_v2  ;;  %1126 = vmatpush.bf16.msra.mxu3 %v1072_v2  ;;  %v463_v18 = vld [vmem:[%s1513_s1 + $0x20] sm:$0xff]  ;;  %v464_v26 = vld [vmem:[%s1513_s1 + $0x28] sm:$0xff]  ;;  %v461_v37 = vld [vmem:[%s1513_s1 + $0x10] sm:$0xff] }
  0x64   : > { %v467_v23 = vld [vmem:[%s1513_s1 + $0x40] sm:$0xff]  ;;  %v468_v35 = vld [vmem:[%s1513_s1 + $0x48] sm:$0xff]  ;;  %v465_v38 = vld [vmem:[%s1513_s1 + $0x30] sm:$0xff] }
  0x65   : > { %v471_v24 = vld [vmem:[%s1513_s1 + $0x60] sm:$0xff]  ;;  %v472_v36 = vld [vmem:[%s1513_s1 + $0x68] sm:$0xff]  ;;  %v469_v47 = vld [vmem:[%s1513_s1 + $0x50] sm:$0xff] }
  0x66   : > { %605 = vmatpush.bf16.msra.mxu0 %v1071_v3  ;;  %1127 = vmatpush.bf16.msra.mxu1 %v1071_v3  ;;  %v473_v48 = vld [vmem:[%s1513_s1 + $0x70] sm:$0xff]  ;;  %v462_v49 = vld [vmem:[%s1513_s1 + $0x18] sm:$0xff] }
  0x67   : > { %1128 = vmatpush.bf16.msra.mxu2 %v1071_v3  ;;  %1129 = vmatpush.bf16.msra.mxu3 %v1071_v3  ;;  %v466_v50 = vld [vmem:[%s1513_s1 + $0x38] sm:$0xff] }
  0x68   : > { %v470_v59 = vld [vmem:[%s1513_s1 + $0x58] sm:$0xff] }
  0x69   : > { %v474_v60 = vld [vmem:[%s1513_s1 + $0x78] sm:$0xff] }
  0x6a   : > { %606 = vmatpush.bf16.msra.mxu0 %v1070_v4  ;;  %1130 = vmatpush.bf16.msra.mxu1 %v1070_v4 }
  0x6b   : > { %1131 = vmatpush.bf16.msra.mxu2 %v1070_v4  ;;  %1132 = vmatpush.bf16.msra.mxu3 %v1070_v4 }
  0x6e   : > { %607 = vmatpush.bf16.msra.mxu0 %v1069_v5  ;;  %1133 = vmatpush.bf16.msra.mxu1 %v1069_v5 }
  0x6f   : > { %1134 = vmatpush.bf16.msra.mxu2 %v1069_v5  ;;  %1135 = vmatpush.bf16.msra.mxu3 %v1069_v5 }
  0x72   : > { %608 = vmatpush.bf16.msra.mxu0 %v1068_v6  ;;  %1136 = vmatpush.bf16.msra.mxu1 %v1068_v6 }
  0x73   : > { %1137 = vmatpush.bf16.msra.mxu2 %v1068_v6  ;;  %1138 = vmatpush.bf16.msra.mxu3 %v1068_v6 }
  0x76   : > { %609 = vmatpush.bf16.msra.mxu0 %v1067_v7  ;;  %1139 = vmatpush.bf16.msra.mxu1 %v1067_v7 }
  0x77   : > { %1140 = vmatpush.bf16.msra.mxu2 %v1067_v7  ;;  %1141 = vmatpush.bf16.msra.mxu3 %v1067_v7 }
  0x7a   : > { %610 = vmatpush.bf16.msra.mxu0 %v1066_v8  ;;  %1142 = vmatpush.bf16.msra.mxu1 %v1066_v8 }
  0x7b   : > { %1143 = vmatpush.bf16.msra.mxu2 %v1066_v8  ;;  %1144 = vmatpush.bf16.msra.mxu3 %v1066_v8 }
  0x7d   : > { %611 = vmatmul.bf16.vlgmr.msra.gmra.mxu0 %v1058_v9  ;;  %621 = vmatmul.bf16.vlgmr.msra.gmra.mxu1 %v1060_v10 }
  0x7e   : > { %631 = vmatmul.bf16.vlgmr.msra.gmra.mxu2 %v1062_v11  ;;  %641 = vmatmul.bf16.vlgmr.msra.gmra.mxu3 %v1064_v12 }
  0x8d   : > { %616 = vmatmul.bf16.gmra.mxu0 %v1059_v13  ;;  %626 = vmatmul.bf16.gmra.mxu1 %v1061_v14 }
  0x8e   : > { %636 = vmatmul.bf16.gmra.mxu2 %v1063_v15  ;;  %646 = vmatmul.bf16.gmra.mxu3 %v1065_v16 }
  0xfa   : > { %v612_v19 = vpop.f32.mrf.mxu0  ;;  %v622_v20 = vpop.f32.mrf.mxu1 }
  0xfb   : > { %v652_v21 = vadd.f32 %v612_v19, %v459_v17  ;;  %v656_v22 = vadd.f32 %v622_v20, %v463_v18 }
  0xfd   : > { %668 = vst [vmem:[%s1513_s1] sm:$0xff] %v652_v21 }
  0xfe   : > { %672 = vst [vmem:[%s1513_s1 + $0x20] sm:$0xff] %v656_v22 }
 0x101   : > { %v632_v27 = vpop.f32.mrf.mxu2  ;;  %v642_v28 = vpop.f32.mrf.mxu3 }
 0x102   : > { %v660_v29 = vadd.f32 %v632_v27, %v467_v23  ;;  %v664_v30 = vadd.f32 %v642_v28, %v471_v24  ;;  %v614_v31 = vpop.f32.mrf.mxu0  ;;  %v624_v32 = vpop.f32.mrf.mxu1 }
 0x103   : > { %v653_v33 = vadd.f32 %v614_v31, %v460_v25  ;;  %v657_v34 = vadd.f32 %v624_v32, %v464_v26 }
 0x104   : > { %676 = vst [vmem:[%s1513_s1 + $0x40] sm:$0xff] %v660_v29 }
 0x105   : > { %680 = vst [vmem:[%s1513_s1 + $0x60] sm:$0xff] %v664_v30 }
 0x106   : > { %669 = vst [vmem:[%s1513_s1 + $0x8] sm:$0xff] %v653_v33 }
 0x107   : > { %673 = vst [vmem:[%s1513_s1 + $0x28] sm:$0xff] %v657_v34 }
 0x109   : > { %v634_v39 = vpop.f32.mrf.mxu2  ;;  %v644_v40 = vpop.f32.mrf.mxu3 }
 0x10a   : > { %v661_v41 = vadd.f32 %v634_v39, %v468_v35  ;;  %v665_v42 = vadd.f32 %v644_v40, %v472_v36  ;;  %v617_v43 = vpop.f32.mrf.mxu0  ;;  %v627_v44 = vpop.f32.mrf.mxu1 }
 0x10b   : > { %v654_v45 = vadd.f32 %v617_v43, %v461_v37  ;;  %v658_v46 = vadd.f32 %v627_v44, %v465_v38 }
 0x10c   : > { %677 = vst [vmem:[%s1513_s1 + $0x48] sm:$0xff] %v661_v41 }
 0x10d   : > { %681 = vst [vmem:[%s1513_s1 + $0x68] sm:$0xff] %v665_v42 }
 0x10e   : > { %670 = vst [vmem:[%s1513_s1 + $0x10] sm:$0xff] %v654_v45 }
 0x10f   : > { %674 = vst [vmem:[%s1513_s1 + $0x30] sm:$0xff] %v658_v46 }
 0x111   : > { %v637_v51 = vpop.f32.mrf.mxu2  ;;  %v647_v52 = vpop.f32.mrf.mxu3 }
 0x112   : > { %v662_v53 = vadd.f32 %v637_v51, %v469_v47  ;;  %v666_v54 = vadd.f32 %v647_v52, %v473_v48  ;;  %v619_v55 = vpop.f32.mrf.mxu0  ;;  %v629_v56 = vpop.f32.mrf.mxu1 }
 0x113   : > { %v655_v57 = vadd.f32 %v619_v55, %v462_v49  ;;  %v659_v58 = vadd.f32 %v629_v56, %v466_v50 }
 0x114   : > { %678 = vst [vmem:[%s1513_s1 + $0x50] sm:$0xff] %v662_v53 }
 0x115   : > { %682 = vst [vmem:[%s1513_s1 + $0x70] sm:$0xff] %v666_v54 }
 0x116   : > { %671 = vst [vmem:[%s1513_s1 + $0x18] sm:$0xff] %v655_v57 }
 0x117   : > { %675 = vst [vmem:[%s1513_s1 + $0x38] sm:$0xff] %v659_v58 }
 0x119   : > { %v639_v61 = vpop.f32.mrf.mxu2  ;;  %v649_v62 = vpop.f32.mrf.mxu3  ;;  %687 = sbr.rel (%p1054_p11) target bundleno = 313 (0x139), region = 44 }
 0x11a   : > { %v663_v63 = vadd.f32 %v639_v61, %v470_v59  ;;  %v667_v0 = vadd.f32 %v649_v62, %v474_v60 }
 0x11c   : > { %679 = vst [vmem:[%s1513_s1 + $0x58] sm:$0xff] %v663_v63 }
 0x11d   : > { %683 = vst [vmem:[%s1513_s1 + $0x78] sm:$0xff] %v667_v0 }
 0x11e   : > { %v688_v1 = vld [vmem:[%s1513_s1] sm:$0xff]  ;;  %v689_v2 = vld [vmem:[%s1513_s1 + $0x8] sm:$0xff]  ;;  %v690_v3 = vld [vmem:[%s1513_s1 + $0x10] sm:$0xff] }
 0x11f   : > { %v1077_v4 = vpack.c.bf16 %v689_v2, %v688_v1  ;;  %v691_v5 = vld [vmem:[%s1513_s1 + $0x18] sm:$0xff]  ;;  %v692_v6 = vld [vmem:[%s1513_s1 + $0x20] sm:$0xff]  ;;  %v693_v7 = vld [vmem:[%s1513_s1 + $0x28] sm:$0xff]  ;;  %v752_v17 = vmul.f32 0.33333334, %v688_v1 }
 0x120   : > { %v1082_v8 = vpack.c.bf16 %v691_v5, %v690_v3  ;;  %v1087_v9 = vpack.c.bf16 %v693_v7, %v692_v6  ;;  %v694_v10 = vld [vmem:[%s1513_s1 + $0x30] sm:$0xff]  ;;  %v695_v11 = vld [vmem:[%s1513_s1 + $0x38] sm:$0xff]  ;;  %v696_v12 = vld [vmem:[%s1513_s1 + $0x40] sm:$0xff]  ;;  %v753_v23 = vmul.f32 0.33333334, %v689_v2 }
 0x121   : > { %1078 = vst [vmem:[%s1508_s23] sm:$0xff] %v1077_v4   ;;  %v1092_v13 = vpack.c.bf16 %v695_v11, %v694_v10  ;;  %v697_v14 = vld [vmem:[%s1513_s1 + $0x48] sm:$0xff]  ;;  %v698_v15 = vld [vmem:[%s1513_s1 + $0x50] sm:$0xff]  ;;  %v700_v20 = vld [vmem:[%s1513_s1 + $0x60] sm:$0xff]  ;;  %v754_v28 = vmul.f32 0.33333334, %v690_v3 }
 0x122   : > { %1114 = vst [vmem:[%s1508_s23 + $0x8] sm:$0xff] %v1082_v8   ;;  %v1097_v18 = vpack.c.bf16 %v697_v14, %v696_v12  ;;  %v701_v21 = vld [vmem:[%s1513_s1 + $0x68] sm:$0xff]  ;;  %v702_v22 = vld [vmem:[%s1513_s1 + $0x70] sm:$0xff]  ;;  %v736_v26 = vld [vmem:[%s1503_s26] sm:$0xff]  ;;  %v755_v31 = vmul.f32 0.33333334, %v691_v5 }
 0x123   : > { %v699_v16 = vld [vmem:[%s1513_s1 + $0x58] sm:$0xff]  ;;  %1115 = vst [vmem:[%s1508_s23 + $0x10] sm:$0xff] %v1087_v9   ;;  %v1107_v24 = vpack.c.bf16 %v701_v21, %v700_v20  ;;  %v737_v27 = vld [vmem:[%s1503_s26 + $0x8] sm:$0xff]  ;;  %v738_v30 = vld [vmem:[%s1503_s26 + $0x10] sm:$0xff]  ;;  %v768_v32 = vadd.f32 %v752_v17, %v736_v26  ;;  %v756_v34 = vmul.f32 0.33333334, %v692_v6 }
 0x124   : > { %v1102_v19 = vpack.c.bf16 %v699_v16, %v698_v15  ;;  %v703_v25 = vld [vmem:[%s1513_s1 + $0x78] sm:$0xff]  ;;  %1116 = vst [vmem:[%s1508_s23 + $0x18] sm:$0xff] %v1092_v13   ;;  %v769_v35 = vadd.f32 %v753_v23, %v737_v27  ;;  %v740_v36 = vld [vmem:[%s1503_s26 + $0x20] sm:$0xff]  ;;  %v757_v37 = vmul.f32 0.33333334, %v693_v7  ;;  %v770_v38 = vadd.f32 %v754_v28, %v738_v30  ;;  %v741_v39 = vld [vmem:[%s1503_s26 + $0x28] sm:$0xff] }
 0x125   : > { %v1112_v29 = vpack.c.bf16 %v703_v25, %v702_v22  ;;  %1117 = vst [vmem:[%s1508_s23 + $0x20] sm:$0xff] %v1097_v18   ;;  %v739_v33 = vld [vmem:[%s1503_s26 + $0x18] sm:$0xff]  ;;  %v758_v40 = vmul.f32 0.33333334, %v694_v10  ;;  %v742_v42 = vld [vmem:[%s1503_s26 + $0x30] sm:$0xff]  ;;  %v772_v44 = vadd.f32 %v756_v34, %v740_v36  ;;  %v744_v48 = vld [vmem:[%s1503_s26 + $0x40] sm:$0xff] }
 0x126   : > { %1118 = vst [vmem:[%s1508_s23 + $0x28] sm:$0xff] %v1102_v19   ;;  %v771_v41 = vadd.f32 %v755_v31, %v739_v33  ;;  %v759_v43 = vmul.f32 0.33333334, %v695_v11  ;;  %v743_v45 = vld [vmem:[%s1503_s26 + $0x38] sm:$0xff]  ;;  %v760_v46 = vmul.f32 0.33333334, %v696_v12  ;;  %v773_v47 = vadd.f32 %v757_v37, %v741_v39 }
 0x127   : > { %1119 = vst [vmem:[%s1508_s23 + $0x30] sm:$0xff] %v1107_v24   ;;  %v761_v49 = vmul.f32 0.33333334, %v697_v14  ;;  %v774_v50 = vadd.f32 %v758_v40, %v742_v42  ;;  %v745_v51 = vld [vmem:[%s1503_s26 + $0x48] sm:$0xff]  ;;  %v762_v52 = vmul.f32 0.33333334, %v698_v15 }
 0x128   : > { %1120 = vst [vmem:[%s1508_s23 + $0x38] sm:$0xff] %v1112_v29   ;;  %v775_v53 = vadd.f32 %v759_v43, %v743_v45  ;;  %v746_v54 = vld [vmem:[%s1503_s26 + $0x50] sm:$0xff]  ;;  %v763_v55 = vmul.f32 0.33333334, %v699_v16  ;;  %v776_v56 = vadd.f32 %v760_v46, %v744_v48  ;;  %v747_v57 = vld [vmem:[%s1503_s26 + $0x58] sm:$0xff]  ;;  %v748_v60 = vld [vmem:[%s1503_s26 + $0x60] sm:$0xff] }
 0x129   : > { %784 = vst [vmem:[%s1513_s1] sm:$0xff] %v768_v32  ;;  %v764_v58 = vmul.f32 0.33333334, %v700_v20  ;;  %v777_v59 = vadd.f32 %v761_v49, %v745_v51  ;;  %v765_v61 = vmul.f32 0.33333334, %v701_v21  ;;  %v778_v62 = vadd.f32 %v762_v52, %v746_v54  ;;  %v749_v63 = vld [vmem:[%s1503_s26 + $0x68] sm:$0xff]  ;;  %v750_v2 = vld [vmem:[%s1503_s26 + $0x70] sm:$0xff] }
 0x12a   : > { %785 = vst [vmem:[%s1513_s1 + $0x8] sm:$0xff] %v769_v35  ;;  %v766_v0 = vmul.f32 0.33333334, %v702_v22  ;;  %v779_v1 = vadd.f32 %v763_v55, %v747_v57  ;;  %v767_v3 = vmul.f32 0.33333334, %v703_v25  ;;  %v751_v5 = vld [vmem:[%s1503_s26 + $0x78] sm:$0xff] }
 0x12b   : > { %786 = vst [vmem:[%s1513_s1 + $0x10] sm:$0xff] %v770_v38  ;;  %v780_v4 = vadd.f32 %v764_v58, %v748_v60  ;;  %v781_v6 = vadd.f32 %v765_v61, %v749_v63 }
 0x12c   : > { %787 = vst [vmem:[%s1513_s1 + $0x18] sm:$0xff] %v771_v41  ;;  %v782_v7 = vadd.f32 %v766_v0, %v750_v2  ;;  %v783_v8 = vadd.f32 %v767_v3, %v751_v5 }
 0x12d   : > { %788 = vst [vmem:[%s1513_s1 + $0x20] sm:$0xff] %v772_v44 }
 0x12e   : > { %789 = vst [vmem:[%s1513_s1 + $0x28] sm:$0xff] %v773_v47 }
 0x12f   : > { %790 = vst [vmem:[%s1513_s1 + $0x30] sm:$0xff] %v774_v50 }
 0x130   : > { %791 = vst [vmem:[%s1513_s1 + $0x38] sm:$0xff] %v775_v53 }
 0x131   : > { %792 = vst [vmem:[%s1513_s1 + $0x40] sm:$0xff] %v776_v56 }
 0x132   : > { %793 = vst [vmem:[%s1513_s1 + $0x48] sm:$0xff] %v777_v59 }
 0x133   : > { %794 = vst [vmem:[%s1513_s1 + $0x50] sm:$0xff] %v778_v62 }
 0x134   : > { %795 = vst [vmem:[%s1513_s1 + $0x58] sm:$0xff] %v779_v1 }
 0x135   : > { %796 = vst [vmem:[%s1513_s1 + $0x60] sm:$0xff] %v780_v4 }
 0x136   : > { %797 = vst [vmem:[%s1513_s1 + $0x68] sm:$0xff] %v781_v6 }
 0x137   : > { %798 = vst [vmem:[%s1513_s1 + $0x70] sm:$0xff] %v782_v7 }
 0x138   : > { %799 = vst [vmem:[%s1513_s1 + $0x78] sm:$0xff] %v783_v8 }
 0x139 PF: > { %s33_s10 = sadd.s32 1, %s1347_s10   ;;  %s1680_s14 = sld [smem:[#allocation11_spill]] }
 0x13a   : > { %p30_p12 = scmp.ge.s32.totalorder %s33_s10, 6   ;;  %s1681_s28 = sld [smem:[#allocation12_spill]] }
 0x13b   : > { %s1682_s29 = smov %s1323_s30  ;;  %s1683_s30 = smov %s1327_s0 }
 0x13c   : > { %s1684_s0 = smov %s1466_s16  ;;  %s1685_s7 = smov %s1339_s8 }
 0x13d   : > { %s1686_s1 = smov %s1343_s9  ;;  %32 = sbr.rel (!%p30_p12) target bundleno = 12 (0xc), region = 98 }
 0x13f   : > { %s1687_s8 = smov %s1680_s14 }
 0x140   : > { %s1688_s9 = smov %s1681_s28 }
 0x142   :  { %851 = vsyncpa [#allocation6], 1 }
 0x143   :  { %853 = vsyncpa [#allocation6 + $0x1], 1 }

// kernel: _lgc_prop_padded.7
= control target key start
LH: loop header
LB: loop body
LE: loop exit
PB: predicated region body
PF: predicated region fallthrough
CT: control target
= control target key end

     0   :  { %s1273_s24 = smov [#allocation3]   ;;  %s1274_s25 = smov [#allocation4]   ;;  %s1658_s0 = inlined_call_operand.vmem [shape: s32[2,2], index: 0, kind: input, shape index: {}]   ;;  %s1659_s2 = inlined_call_operand.hbm [shape: bf16[5,128,128], index: 2, kind: input, shape index: {}]   ;;  %s1660_s3 = inlined_call_operand.vmem [shape: bf16[256,128], index: 3, kind: input, shape index: {}]   ;;  %s1661_s4 = inlined_call_operand.vmem [shape: f32[256,128], index: 4, kind: input, shape index: {}]   ;;  %s1662_s5 = inlined_call_operand.hbm [shape: f32[256,128], index: 5, kind: output, shape index: {}]   ;;  %s1663_s1 = inlined_call_operand.vmem [shape: s32[2,2], index: 1, kind: input, shape index: {}]  }
   0x1   :  { %s11_s20 = sshll.u32 %s1658_s0, 4  ;;  %s16_s23 = sshll.u32 %s1663_s1, 4  ;;  %s12_s20 = int_to_ptr.vmem [resolvable:$true] %s11_s20  ;;  %s17_s23 = int_to_ptr.vmem [resolvable:$true] %s16_s23 }
   0x2   :  { %14 = dma.vmem_to_smem %s12_s20, 32, %s1273_s24, [#allocation2] }
   0x3   :  { %19 = dma.vmem_to_smem %s17_s23, 32, %s1274_s25, [#allocation2] }
   0x4   :  { %1219 = dma.done.wait [#allocation2], 64 }
   0x5   :  { %1220 = vsyncadd [#allocation2], 4294967232 }
   0x6   :  { %22 = sfence }
   0x7   :  { %23 = vsyncpa [#allocation6], 0 }
   0x8   :  { %25 = vsyncpa [#allocation6 + $0x1], 0 }
   0x9   :  { %26 = vsyncpa [#allocation7], 0 }
   0xa   :  { %28 = vsyncpa [#allocation7 + $0x1], 0  ;;  %s1316_s26 = smov 0   ;;  %s1318_s0 = smov 0  }
   0xb   :  { %s1320_s27 = smov 0   ;;  %s1322_s1 = smov 0  }
   0xc   :  { %s1324_s28 = smov 0   ;;  %s1326_s29 = smov 0  }
   0xd   :  { %s1328_s30 = smov 0   ;;  %s1330_s6 = smov 0  }
   0xe   :  { %s1332_s7 = smov 0   ;;  %s1334_s8 = smov 0  }
   0xf   :  { %s1336_s9 = smov 0  }
  0x10 LB: > { %1669 = sst [smem:[#allocation14_spill]] %s1251_s29  ;;  %s847_s10 = sadd.s32 4294967295, %s1271_s9   ;;  %s1271_s9 = sphi %s1336_s9, %s34_s9   ;;  %s1267_s8 = sphi %s1334_s8, %s1688_s8   ;;  %s1263_s7 = sphi %s1332_s7, %s1687_s7   ;;  %s1259_s6 = sphi %s1330_s6, %s1686_s6   ;;  %s1255_s30 = sphi %s1328_s30, %s1695_s30   ;;  %s1251_s29 = sphi %s1326_s29, %s1694_s29   ;;  %s1247_s28 = sphi %s1324_s28, %s1693_s28   ;;  %s1243_s1 = sphi %s1322_s1, %s1692_s1   ;;  %s1239_s27 = sphi %s1320_s27, %s1691_s27   ;;  %s1235_s0 = sphi %s1318_s0, %s1690_s0   ;;  %s1231_s26 = sphi %s1316_s26, %s1689_s26  }
  0x11   : > { %1670 = sst [smem:[#allocation15_spill]] %s1263_s7  ;;  %s848_s11 = sadd.s32 4294967294, %s1271_s9  }
  0x12   : > { %1671 = sst [smem:[#allocation16_spill]] %s1267_s8  ;;  %s46_s12 = sadd.s32 1, %s1263_s7 }
  0x13   : > { %s53_s13 = sadd.s32 1, %s1267_s8  ;;  %p47_p0 = scmp.ge.s32.totalorder %s46_s12, 2 }
  0x14   : > { %s57_s14 = sshra.s32 %s1263_s7, 7  ;;  %s62_s16 = sand.u32 127, %s1263_s7 }
  0x15   : > { %s59_s15 = sadd.s32 %s1267_s8, %s57_s14  ;;  %s1697_s12 = smov (%p47_p0, %s46_s12), 0 }
  0x16   : > { %1672 = sst [smem:[#allocation17_spill]] %s1697_s12  ;;  %s1699_s13 = smov (!%p47_p0, %s53_s13), %s1267_s8 }
  0x17   : > { %s849_s17 = sshll.u32 %s59_s15, 7  ;;  %s65_s18 = sshra.s32 %s1697_s12, 7 }
  0x18   : > { %p55_p1 = scmp.ge.s32.totalorder %s1699_s13, 2  ;;  %s1382_s19 = sadd.s32 %s849_s17, %s62_s16 }
  0x19   : > { %s64_s20 = sld [smem:[#allocation3 + %s1382_s19]]  ;;  %s70_s21 = sand.u32 127, %s1697_s12 }
  0x1a   : > { %s1701_s13 = smov (%p55_p1, %s1699_s13), 0  ;;  %s76_s22 = sadd.s32 1, %s1251_s29 }
  0x1b   : > { %1673 = sst [smem:[#allocation18_spill]] %s1701_s13  ;;  %p83_p2 = scmp.ne.s32.totalorder %s1251_s29, %s1247_s28 }
  0x1c   : > { %s67_s23 = sadd.s32 %s65_s18, %s1701_s13  ;;  %p84_p3 = scmp.eq.s32.totalorder %s1271_s9, 0 }
  0x1d   : > { %s850_s24 = sshll.u32 %s67_s23, 7  ;;  %p89_p4 = scmp.ne.s32.totalorder %s1247_s28, %s1243_s1 }
  0x1e   : > { %s71_s25 = sadd.s32 %s850_s24, %s70_s21  ;;  %p1395_p5 = por %p84_p3, %p83_p2 }
  0x1f   : > { %s72_s15 = sld [smem:[#allocation3 + %s71_s25]]  ;;  %p90_p6 = scmp.eq.s32.totalorder %s847_s10, 0 }
  0x20   : > { %s171_s16 = ssub.s32 %s1267_s8, %s1701_s13  ;;  %s176_s17 = sadd.s32 1, %s1239_s27 }
  0x21   : > { %p1404_p7 = por %p90_p6, %p89_p4  ;;  %p174_p8 = scmp.eq.s32.totalorder %s171_s16, 0 }
  0x22   : > { %p186_p9 = scmp.ne.s32.totalorder %s1239_s27, %s1235_s0  ;;  %p187_p10 = scmp.eq.s32.totalorder %s847_s10, 3 }
  0x23   : > { %s1413_s1 = scalar_select %p174_p8, %s1239_s27, %s176_s17  }
  0x24   : > { %p1415_p11 = por %p187_p10, %p186_p9  ;;  %p192_p12 = scmp.ne.s32.totalorder %s1235_s0, %s1231_s26 }
  0x25   : > { %1676 = sst [smem:[#allocation19_spill]] %s1413_s1  ;;  %s73_s23 = ssub.s32 %s64_s20, %s72_s15 }
  0x26   : > { %p193_p13 = scmp.eq.s32.totalorder %s848_s11, 3  ;;  %p74_p0 = scmp.eq.s32.totalorder %s73_s23, 0 }
  0x27   : > { %p996_p2 = scmp.lt.s32.totalorder %s1271_s9, 4  ;;  %s213_s10 = sand.u32 1, %s1251_s29  }
  0x28   : > { %p1423_p1 = por %p193_p13, %p192_p12  ;;  %s855_s17 = sshll.u32 %s213_s10, 6 }
  0x29   : > { %s1429_s25 = scalar_select %p74_p0, %s1251_s29, %s76_s22  }
  0x2a   : > { %p1434_p3 = pnand %p996_p2, %p1395_p5  ;;  %s1703_s19 = smov (!%p1395_p5, %s1382_s19), 0 }
  0x2b   : > { %1679 = sst [smem:[#allocation20_spill]] %s1429_s25  ;;  %s1707_s19 = smov (!%p996_p2, %s1703_s19), 0 }
  0x2c   : > { %s980_s13 = scalar_select %p1395_p5, [#allocation3], [#allocation9] }
  0x2d   : > { %p859_p4 = scmp.ge.s32.totalorder %s1271_s9, 1  ;;  %p281_p6 = scmp.lt.s32.totalorder %s1271_s9, 5 }
  0x2e   : > { %s1705_s13 = smov (!%p996_p2, %s980_s13), [#allocation10]  ;;  %s217_s20 = scalar_lea.vmem [#allocation5], %s855_s17 }
  0x2f   : > { %s225_s11 = sld [smem:[%s1705_s13 + %s1707_s19]]  ;;  %s233_s22 = sshll.u32 %s217_s20, 4  ;;  %s234_s22 = int_to_ptr.vmem [resolvable:$true] %s233_s22 }
  0x30   : > { %p1445_p8 = pnand %p859_p4, %p281_p6  ;;  %s214_s25 = scalar_lea.sflag [#allocation6], %s213_s10 }
  0x31   : > { %p1121_p9 = pneg %p1434_p3 }
  0x35   : > { %s938_s23 = sshll.u32 %s225_s11, 6  ;;  %s1124_s11 = scalar_lea.hbm %s1659_s2, 320 }
  0x36   : > { %s230_s7 = scalar_lea.hbm %s1659_s2, %s938_s23 }
  0x37   : > { %s231_s14 = sshll.u32 %s230_s7, 4  ;;  %s232_s14 = int_to_ptr.hbm [resolvable:$true] %s231_s14 }
  0x38   : > { %s1117_s29 = sshra.s32 %s232_s14, 4  ;;  %s1118_s29 = int_to_ptr.hbm [resolvable:$true] %s1117_s29 }
  0x39   : > { %s1119_s13 = scalar_lea.hbm %s1118_s29, 64  ;;  %p1125_p13 = scmp.lt.s32.totalorder %s1118_s29, %s1659_s2 }
  0x3a   : > { %p1120_p5 = scmp.ne.s32.totalorder %s1118_s29, %s1119_s13  ;;  %p1126_p0 = scmp.lt.s32.totalorder %s1124_s11, %s1119_s13 }
  0x3c   : > { %p1122_p10 = pnand %p1121_p9, %p1120_p5  ;;  %p1127_p2 = por %p1126_p0, %p1125_p13 }
  0x3e   : > { %p1123_p12 = pneg %p1122_p10 }
  0x40   : > { %p1128_p4 = pnand %p1127_p2, %p1123_p12 }
  0x42   : > { %1131 = shalt.err (!%p1128_p4)
}
  0x43   : > { %s1275_s7 = smov 64   ;;  %s1276_s8 = smov 4  }
  0x44   : > { %991 = dma.hbm_to_vmem [thread:$0]  (!%p1434_p3), %s232_s14, 1024, %s234_s22, %s214_s25, %s1275_s7, %s1275_s7, %s1276_s8  }
  0x45   : > { %285 = sbr.rel (%p1445_p8) target bundleno = 339 (0x153), region = 32  ;;  %s287_s12 = sand.u32 (!%p1445_p8), 1, %s1247_s28  }
  0x46   : > { %s860_s10 = sshll.u32 (!%p1445_p8), %s287_s12, 6  ;;  %s288_s23 = scalar_lea.sflag (!%p1445_p8), [#allocation6], %s287_s12 }
  0x47   : > { %s1465_s19 = scalar_lea.vmem (!%p1445_p8), [#allocation5], %s860_s10 }
  0x4a   : > { %1222 = dma.done.wait (%p1404_p7), %s288_s23, 1024  }
  0x4b   : > { %1224 = vsyncadd (%p1404_p7), %s288_s23, 4294966272  ;;  %s347_s29 = sshra.s32 %s1255_s30, 7  ;;  %s352_s1 = sand.u32 127, %s1255_s30 }
  0x4c   : > { %s349_s25 = sadd.s32 %s1259_s6, %s347_s29  ;;  %s336_s16 = sand.u32 1, %s1235_s0  }
  0x4d   : > { %s862_s22 = sshll.u32 %s349_s25, 7  ;;  %s861_s15 = sshll.u32 %s336_s16, 7 }
  0x4e   : > { %s353_s14 = sadd.s32 %s862_s22, %s352_s1  ;;  %s865_s17 = sshll.u32 %s1259_s6, 4 }
  0x4f   : > { %s354_s13 = sld [smem:[#allocation4 + %s353_s14]]  ;;  %p373_p3 = scmp.lt.s32.totalorder %s865_s17, 31 }
  0x50   : > { %s1488_s1 = scalar_lea.vmem [#allocation8], %s861_s15  ;;  %p867_p6 = scmp.ne.s32.totalorder %s1255_s30, 0 }
  0x51   : > { %s1709_s17 = smov (!%p373_p3, %s865_s17), 31 }
  0x52   : > { %s866_s18 = sshll.u32 %s1709_s17, 3 }
  0x53   : > { %s1481_s8 = scalar_lea.vmem %s1661_s4, %s866_s18 }
  0x55   : > { %s863_s11 = sshll.u32 %s354_s13, 4 }
  0x56   : > { %p356_p7 = scmp.lt.s32.totalorder %s863_s11, 31  ;;  %385 = sbr.rel (%p867_p6) target bundleno = 108 (0x6c), region = 40 }
  0x58   : > { %s1711_s11 = smov (!%p356_p7, %s863_s11), 31 }
  0x59   : > { %s864_s12 = sshll.u32 %s1711_s11, 2 }
  0x5a   : > { %s1486_s29 = scalar_lea.vmem %s1660_s3, %s864_s12 }
  0x5b   : > { %v1277_v0 = vmov 0.0  }
  0x5c   : > { %386 = vst [vmem:[%s1488_s1] sm:$0xff] %v1277_v0 }
  0x5d   : > { %387 = vst [vmem:[%s1488_s1 + $0x8] sm:$0xff] %v1277_v0 }
  0x5e   : > { %388 = vst [vmem:[%s1488_s1 + $0x10] sm:$0xff] %v1277_v0 }
  0x5f   : > { %389 = vst [vmem:[%s1488_s1 + $0x18] sm:$0xff] %v1277_v0 }
  0x60   : > { %390 = vst [vmem:[%s1488_s1 + $0x20] sm:$0xff] %v1277_v0 }
  0x61   : > { %391 = vst [vmem:[%s1488_s1 + $0x28] sm:$0xff] %v1277_v0 }
  0x62   : > { %392 = vst [vmem:[%s1488_s1 + $0x30] sm:$0xff] %v1277_v0 }
  0x63   : > { %393 = vst [vmem:[%s1488_s1 + $0x38] sm:$0xff] %v1277_v0 }
  0x64   : > { %394 = vst [vmem:[%s1488_s1 + $0x40] sm:$0xff] %v1277_v0 }
  0x65   : > { %395 = vst [vmem:[%s1488_s1 + $0x48] sm:$0xff] %v1277_v0 }
  0x66   : > { %396 = vst [vmem:[%s1488_s1 + $0x50] sm:$0xff] %v1277_v0 }
  0x67   : > { %397 = vst [vmem:[%s1488_s1 + $0x58] sm:$0xff] %v1277_v0 }
  0x68   : > { %398 = vst [vmem:[%s1488_s1 + $0x60] sm:$0xff] %v1277_v0 }
  0x69   : > { %399 = vst [vmem:[%s1488_s1 + $0x68] sm:$0xff] %v1277_v0 }
  0x6a   : > { %400 = vst [vmem:[%s1488_s1 + $0x70] sm:$0xff] %v1277_v0 }
  0x6b   : > { %401 = vst [vmem:[%s1488_s1 + $0x78] sm:$0xff] %v1277_v0 }
  0x6c PF: > { %v954_v1 = vld [vmem:[%s1486_s29 + $0x38] sm:$0xff]  ;;  %v953_v2 = vld [vmem:[%s1486_s29 + $0x30] sm:$0xff]  ;;  %v952_v3 = vld [vmem:[%s1486_s29 + $0x28] sm:$0xff]  ;;  %p932_p8 = scmp.ne.s32.totalorder %s1255_s30, 1 }
  0x6d   : > { %546 = vmatpush.bf16.msra.mxu0 %v954_v1  ;;  %956 = vmatpush.bf16.msra.mxu1 %v954_v1  ;;  %v951_v4 = vld [vmem:[%s1486_s29 + $0x20] sm:$0xff]  ;;  %v950_v5 = vld [vmem:[%s1486_s29 + $0x18] sm:$0xff]  ;;  %v949_v6 = vld [vmem:[%s1486_s29 + $0x10] sm:$0xff] }
  0x6e   : > { %957 = vmatpush.bf16.msra.mxu2 %v954_v1  ;;  %958 = vmatpush.bf16.msra.mxu3 %v954_v1  ;;  %v948_v7 = vld [vmem:[%s1486_s29 + $0x8] sm:$0xff]  ;;  %v947_v8 = vld [vmem:[%s1486_s29] sm:$0xff]  ;;  %v941_v10 = vld [vmem:[%s1465_s19 + $0x10] sm:$0xff] }
  0x6f   : > { %v939_v9 = vld [vmem:[%s1465_s19] sm:$0xff]  ;;  %v945_v12 = vld [vmem:[%s1465_s19 + $0x30] sm:$0xff]  ;;  %v940_v13 = vld [vmem:[%s1465_s19 + $0x8] sm:$0xff] }
  0x70   : > { %v943_v11 = vld [vmem:[%s1465_s19 + $0x20] sm:$0xff]  ;;  %v942_v14 = vld [vmem:[%s1465_s19 + $0x18] sm:$0xff]  ;;  %v944_v15 = vld [vmem:[%s1465_s19 + $0x28] sm:$0xff] }
  0x71   : > { %547 = vmatpush.bf16.msra.mxu0 %v953_v2  ;;  %959 = vmatpush.bf16.msra.mxu1 %v953_v2  ;;  %v946_v16 = vld [vmem:[%s1465_s19 + $0x38] sm:$0xff]  ;;  %v402_v17 = vld [vmem:[%s1488_s1] sm:$0xff]  ;;  %v403_v25 = vld [vmem:[%s1488_s1 + $0x8] sm:$0xff] }
  0x72   : > { %960 = vmatpush.bf16.msra.mxu2 %v953_v2  ;;  %961 = vmatpush.bf16.msra.mxu3 %v953_v2  ;;  %v406_v18 = vld [vmem:[%s1488_s1 + $0x20] sm:$0xff]  ;;  %v407_v26 = vld [vmem:[%s1488_s1 + $0x28] sm:$0xff]  ;;  %v404_v37 = vld [vmem:[%s1488_s1 + $0x10] sm:$0xff] }
  0x73   : > { %v410_v23 = vld [vmem:[%s1488_s1 + $0x40] sm:$0xff]  ;;  %v411_v35 = vld [vmem:[%s1488_s1 + $0x48] sm:$0xff]  ;;  %v408_v38 = vld [vmem:[%s1488_s1 + $0x30] sm:$0xff] }
  0x74   : > { %v414_v24 = vld [vmem:[%s1488_s1 + $0x60] sm:$0xff]  ;;  %v415_v36 = vld [vmem:[%s1488_s1 + $0x68] sm:$0xff]  ;;  %v412_v47 = vld [vmem:[%s1488_s1 + $0x50] sm:$0xff] }
  0x75   : > { %548 = vmatpush.bf16.msra.mxu0 %v952_v3  ;;  %962 = vmatpush.bf16.msra.mxu1 %v952_v3  ;;  %v416_v48 = vld [vmem:[%s1488_s1 + $0x70] sm:$0xff]  ;;  %v405_v49 = vld [vmem:[%s1488_s1 + $0x18] sm:$0xff] }
  0x76   : > { %963 = vmatpush.bf16.msra.mxu2 %v952_v3  ;;  %964 = vmatpush.bf16.msra.mxu3 %v952_v3  ;;  %v409_v50 = vld [vmem:[%s1488_s1 + $0x38] sm:$0xff] }
  0x77   : > { %v413_v59 = vld [vmem:[%s1488_s1 + $0x58] sm:$0xff] }
  0x78   : > { %v417_v60 = vld [vmem:[%s1488_s1 + $0x78] sm:$0xff] }
  0x79   : > { %549 = vmatpush.bf16.msra.mxu0 %v951_v4  ;;  %965 = vmatpush.bf16.msra.mxu1 %v951_v4 }
  0x7a   : > { %966 = vmatpush.bf16.msra.mxu2 %v951_v4  ;;  %967 = vmatpush.bf16.msra.mxu3 %v951_v4 }
  0x7d   : > { %550 = vmatpush.bf16.msra.mxu0 %v950_v5  ;;  %968 = vmatpush.bf16.msra.mxu1 %v950_v5 }
  0x7e   : > { %969 = vmatpush.bf16.msra.mxu2 %v950_v5  ;;  %970 = vmatpush.bf16.msra.mxu3 %v950_v5 }
  0x81   : > { %551 = vmatpush.bf16.msra.mxu0 %v949_v6  ;;  %971 = vmatpush.bf16.msra.mxu1 %v949_v6 }
  0x82   : > { %972 = vmatpush.bf16.msra.mxu2 %v949_v6  ;;  %973 = vmatpush.bf16.msra.mxu3 %v949_v6 }
  0x85   : > { %552 = vmatpush.bf16.msra.mxu0 %v948_v7  ;;  %974 = vmatpush.bf16.msra.mxu1 %v948_v7 }
  0x86   : > { %975 = vmatpush.bf16.msra.mxu2 %v948_v7  ;;  %976 = vmatpush.bf16.msra.mxu3 %v948_v7 }
  0x89   : > { %553 = vmatpush.bf16.msra.mxu0 %v947_v8  ;;  %977 = vmatpush.bf16.msra.mxu1 %v947_v8 }
  0x8a   : > { %978 = vmatpush.bf16.msra.mxu2 %v947_v8  ;;  %979 = vmatpush.bf16.msra.mxu3 %v947_v8 }
  0x8c   : > { %554 = vmatmul.bf16.vlgmr.msra.gmra.mxu0 %v939_v9  ;;  %564 = vmatmul.bf16.vlgmr.msra.gmra.mxu1 %v941_v10 }
  0x8d   : > { %574 = vmatmul.bf16.vlgmr.msra.gmra.mxu2 %v943_v11  ;;  %584 = vmatmul.bf16.vlgmr.msra.gmra.mxu3 %v945_v12 }
  0x9c   : > { %559 = vmatmul.bf16.gmra.mxu0 %v940_v13  ;;  %569 = vmatmul.bf16.gmra.mxu1 %v942_v14 }
  0x9d   : > { %579 = vmatmul.bf16.gmra.mxu2 %v944_v15  ;;  %589 = vmatmul.bf16.gmra.mxu3 %v946_v16 }
 0x109   : > { %v555_v19 = vpop.f32.mrf.mxu0  ;;  %v565_v20 = vpop.f32.mrf.mxu1 }
 0x10a   : > { %v595_v21 = vadd.f32 %v555_v19, %v402_v17  ;;  %v599_v22 = vadd.f32 %v565_v20, %v406_v18 }
 0x10c   : > { %611 = vst [vmem:[%s1488_s1] sm:$0xff] %v595_v21 }
 0x10d   : > { %615 = vst [vmem:[%s1488_s1 + $0x20] sm:$0xff] %v599_v22 }
 0x110   : > { %v575_v27 = vpop.f32.mrf.mxu2  ;;  %v585_v28 = vpop.f32.mrf.mxu3 }
 0x111   : > { %v603_v29 = vadd.f32 %v575_v27, %v410_v23  ;;  %v607_v30 = vadd.f32 %v585_v28, %v414_v24  ;;  %v557_v31 = vpop.f32.mrf.mxu0  ;;  %v567_v32 = vpop.f32.mrf.mxu1 }
 0x112   : > { %v596_v33 = vadd.f32 %v557_v31, %v403_v25  ;;  %v600_v34 = vadd.f32 %v567_v32, %v407_v26 }
 0x113   : > { %619 = vst [vmem:[%s1488_s1 + $0x40] sm:$0xff] %v603_v29 }
 0x114   : > { %623 = vst [vmem:[%s1488_s1 + $0x60] sm:$0xff] %v607_v30 }
 0x115   : > { %612 = vst [vmem:[%s1488_s1 + $0x8] sm:$0xff] %v596_v33 }
 0x116   : > { %616 = vst [vmem:[%s1488_s1 + $0x28] sm:$0xff] %v600_v34 }
 0x118   : > { %v577_v39 = vpop.f32.mrf.mxu2  ;;  %v587_v40 = vpop.f32.mrf.mxu3 }
 0x119   : > { %v604_v41 = vadd.f32 %v577_v39, %v411_v35  ;;  %v608_v42 = vadd.f32 %v587_v40, %v415_v36  ;;  %v560_v43 = vpop.f32.mrf.mxu0  ;;  %v570_v44 = vpop.f32.mrf.mxu1 }
 0x11a   : > { %v597_v45 = vadd.f32 %v560_v43, %v404_v37  ;;  %v601_v46 = vadd.f32 %v570_v44, %v408_v38 }
 0x11b   : > { %620 = vst [vmem:[%s1488_s1 + $0x48] sm:$0xff] %v604_v41 }
 0x11c   : > { %624 = vst [vmem:[%s1488_s1 + $0x68] sm:$0xff] %v608_v42 }
 0x11d   : > { %613 = vst [vmem:[%s1488_s1 + $0x10] sm:$0xff] %v597_v45 }
 0x11e   : > { %617 = vst [vmem:[%s1488_s1 + $0x30] sm:$0xff] %v601_v46 }
 0x120   : > { %v580_v51 = vpop.f32.mrf.mxu2  ;;  %v590_v52 = vpop.f32.mrf.mxu3 }
 0x121   : > { %v605_v53 = vadd.f32 %v580_v51, %v412_v47  ;;  %v609_v54 = vadd.f32 %v590_v52, %v416_v48  ;;  %v562_v55 = vpop.f32.mrf.mxu0  ;;  %v572_v56 = vpop.f32.mrf.mxu1 }
 0x122   : > { %v598_v57 = vadd.f32 %v562_v55, %v405_v49  ;;  %v602_v58 = vadd.f32 %v572_v56, %v409_v50 }
 0x123   : > { %621 = vst [vmem:[%s1488_s1 + $0x50] sm:$0xff] %v605_v53 }
 0x124   : > { %625 = vst [vmem:[%s1488_s1 + $0x70] sm:$0xff] %v609_v54 }
 0x125   : > { %614 = vst [vmem:[%s1488_s1 + $0x18] sm:$0xff] %v598_v57 }
 0x126   : > { %618 = vst [vmem:[%s1488_s1 + $0x38] sm:$0xff] %v602_v58 }
 0x128   : > { %v582_v61 = vpop.f32.mrf.mxu2  ;;  %v592_v62 = vpop.f32.mrf.mxu3  ;;  %630 = sbr.rel (%p932_p8) target bundleno = 323 (0x143), region = 44 }
 0x129   : > { %v606_v63 = vadd.f32 %v582_v61, %v413_v59  ;;  %v610_v0 = vadd.f32 %v592_v62, %v417_v60 }
 0x12b   : > { %622 = vst [vmem:[%s1488_s1 + $0x58] sm:$0xff] %v606_v63 }
 0x12c   : > { %626 = vst [vmem:[%s1488_s1 + $0x78] sm:$0xff] %v610_v0 }
 0x12d   : > { %v631_v1 = vld [vmem:[%s1481_s8] sm:$0xff]  ;;  %v632_v3 = vld [vmem:[%s1481_s8 + $0x8] sm:$0xff]  ;;  %v633_v6 = vld [vmem:[%s1481_s8 + $0x10] sm:$0xff] }
 0x12e   : > { %v647_v2 = vld [vmem:[%s1488_s1] sm:$0xff]  ;;  %v648_v5 = vld [vmem:[%s1488_s1 + $0x8] sm:$0xff]  ;;  %v649_v7 = vld [vmem:[%s1488_s1 + $0x10] sm:$0xff] }
 0x12f   : > { %v663_v4 = vmul.f32 0.33333334, %v647_v2  ;;  %v664_v8 = vmul.f32 0.33333334, %v648_v5  ;;  %v665_v9 = vmul.f32 0.33333334, %v649_v7 }
 0x130   : > { %v634_v10 = vld [vmem:[%s1481_s8 + $0x18] sm:$0xff]  ;;  %v635_v14 = vld [vmem:[%s1481_s8 + $0x20] sm:$0xff]  ;;  %v636_v16 = vld [vmem:[%s1481_s8 + $0x28] sm:$0xff] }
 0x131   : > { %v650_v11 = vld [vmem:[%s1488_s1 + $0x18] sm:$0xff]  ;;  %v679_v12 = vadd.f32 %v663_v4, %v631_v1  ;;  %v651_v15 = vld [vmem:[%s1488_s1 + $0x20] sm:$0xff]  ;;  %v680_v17 = vadd.f32 %v664_v8, %v632_v3  ;;  %v681_v18 = vadd.f32 %v665_v9, %v633_v6  ;;  %v652_v20 = vld [vmem:[%s1488_s1 + $0x28] sm:$0xff] }
 0x132   : > { %v666_v13 = vmul.f32 0.33333334, %v650_v11  ;;  %v667_v19 = vmul.f32 0.33333334, %v651_v15  ;;  %v637_v21 = vld [vmem:[%s1481_s8 + $0x30] sm:$0xff]  ;;  %v638_v26 = vld [vmem:[%s1481_s8 + $0x38] sm:$0xff] }
 0x133   : > { %v653_v22 = vld [vmem:[%s1488_s1 + $0x30] sm:$0xff]  ;;  %695 = vst [vmem:[%s1488_s1] sm:$0xff] %v679_v12  ;;  %v668_v24 = vmul.f32 0.33333334, %v652_v20  ;;  %v654_v27 = vld [vmem:[%s1488_s1 + $0x38] sm:$0xff]  ;;  %v639_v30 = vld [vmem:[%s1481_s8 + $0x40] sm:$0xff] }
 0x134   : > { %v682_v23 = vadd.f32 %v666_v13, %v634_v10  ;;  %v669_v25 = vmul.f32 0.33333334, %v653_v22  ;;  %696 = vst [vmem:[%s1488_s1 + $0x8] sm:$0xff] %v680_v17  ;;  %v683_v28 = vadd.f32 %v667_v19, %v635_v14  ;;  %v670_v29 = vmul.f32 0.33333334, %v654_v27  ;;  %v655_v31 = vld [vmem:[%s1488_s1 + $0x40] sm:$0xff] }
 0x135   : > { %697 = vst [vmem:[%s1488_s1 + $0x10] sm:$0xff] %v681_v18  ;;  %v684_v32 = vadd.f32 %v668_v24, %v636_v16  ;;  %v671_v34 = vmul.f32 0.33333334, %v655_v31  ;;  %v640_v35 = vld [vmem:[%s1481_s8 + $0x48] sm:$0xff]  ;;  %v657_v37 = vld [vmem:[%s1488_s1 + $0x50] sm:$0xff]  ;;  %v642_v43 = vld [vmem:[%s1481_s8 + $0x58] sm:$0xff] }
 0x136   : > { %v685_v33 = vadd.f32 %v669_v25, %v637_v21  ;;  %v656_v36 = vld [vmem:[%s1488_s1 + $0x48] sm:$0xff]  ;;  %698 = vst [vmem:[%s1488_s1 + $0x18] sm:$0xff] %v682_v23  ;;  %v686_v38 = vadd.f32 %v670_v29, %v638_v26  ;;  %v641_v40 = vld [vmem:[%s1481_s8 + $0x50] sm:$0xff]  ;;  %v673_v41 = vmul.f32 0.33333334, %v657_v37  ;;  %v658_v44 = vld [vmem:[%s1488_s1 + $0x58] sm:$0xff] }
 0x137   : > { %v672_v39 = vmul.f32 0.33333334, %v656_v36  ;;  %699 = vst [vmem:[%s1488_s1 + $0x20] sm:$0xff] %v683_v28  ;;  %v687_v42 = vadd.f32 %v671_v34, %v639_v30  ;;  %v659_v45 = vld [vmem:[%s1488_s1 + $0x60] sm:$0xff]  ;;  %v674_v47 = vmul.f32 0.33333334, %v658_v44 }
 0x138   : > { %700 = vst [vmem:[%s1488_s1 + $0x28] sm:$0xff] %v684_v32  ;;  %v643_v48 = vld [vmem:[%s1481_s8 + $0x60] sm:$0xff]  ;;  %v675_v49 = vmul.f32 0.33333334, %v659_v45  ;;  %v689_v50 = vadd.f32 %v673_v41, %v641_v40  ;;  %v644_v51 = vld [vmem:[%s1481_s8 + $0x68] sm:$0xff]  ;;  %v661_v53 = vld [vmem:[%s1488_s1 + $0x70] sm:$0xff] }
 0x139   : > { %v688_v46 = vadd.f32 %v672_v39, %v640_v35  ;;  %701 = vst [vmem:[%s1488_s1 + $0x30] sm:$0xff] %v685_v33  ;;  %v660_v52 = vld [vmem:[%s1488_s1 + $0x68] sm:$0xff]  ;;  %v690_v54 = vadd.f32 %v674_v47, %v642_v43  ;;  %v645_v56 = vld [vmem:[%s1481_s8 + $0x70] sm:$0xff]  ;;  %v677_v57 = vmul.f32 0.33333334, %v661_v53  ;;  %v646_v59 = vld [vmem:[%s1481_s8 + $0x78] sm:$0xff] }
 0x13a   : > { %702 = vst [vmem:[%s1488_s1 + $0x38] sm:$0xff] %v686_v38  ;;  %v676_v55 = vmul.f32 0.33333334, %v660_v52  ;;  %v691_v58 = vadd.f32 %v675_v49, %v643_v48  ;;  %v662_v60 = vld [vmem:[%s1488_s1 + $0x78] sm:$0xff] }
 0x13b   : > { %703 = vst [vmem:[%s1488_s1 + $0x40] sm:$0xff] %v687_v42  ;;  %v678_v62 = vmul.f32 0.33333334, %v662_v60  ;;  %v693_v63 = vadd.f32 %v677_v57, %v645_v56 }
 0x13c   : > { %704 = vst [vmem:[%s1488_s1 + $0x48] sm:$0xff] %v688_v46  ;;  %v692_v61 = vadd.f32 %v676_v55, %v644_v51 }
 0x13d   : > { %705 = vst [vmem:[%s1488_s1 + $0x50] sm:$0xff] %v689_v50  ;;  %v694_v0 = vadd.f32 %v678_v62, %v646_v59 }
 0x13e   : > { %706 = vst [vmem:[%s1488_s1 + $0x58] sm:$0xff] %v690_v54 }
 0x13f   : > { %707 = vst [vmem:[%s1488_s1 + $0x60] sm:$0xff] %v691_v58 }
 0x140   : > { %708 = vst [vmem:[%s1488_s1 + $0x68] sm:$0xff] %v692_v61 }
 0x141   : > { %709 = vst [vmem:[%s1488_s1 + $0x70] sm:$0xff] %v693_v63 }
 0x142   : > { %710 = vst [vmem:[%s1488_s1 + $0x78] sm:$0xff] %v694_v0 }
 0x143 PF: > { %s955_s30 = sshll.u32 %s1259_s6, 7  ;;  %s725_s15 = sshll.u32 %s1488_s1, 4  ;;  %s726_s15 = int_to_ptr.vmem [resolvable:$true] %s725_s15 }
 0x144   : > { %s724_s22 = scalar_lea.hbm %s1662_s5, %s955_s30  ;;  %s712_s13 = scalar_lea.sflag [#allocation7], %s336_s16 }
 0x145   : > { %s727_s14 = sshll.u32 %s724_s22, 4  ;;  %s1167_s6 = scalar_lea.hbm %s1662_s5, 256  ;;  %s728_s14 = int_to_ptr.hbm [resolvable:$true] %s727_s14 }
 0x146   : > { %s1161_s17 = sshra.s32 %s728_s14, 4  ;;  %s1162_s17 = int_to_ptr.hbm [resolvable:$true] %s1161_s17 }
 0x147   : > { %s1163_s18 = scalar_lea.hbm %s1162_s17, 128  ;;  %p1168_p12 = scmp.lt.s32.totalorder %s1162_s17, %s1662_s5 }
 0x148   : > { %p1164_p5 = scmp.ne.s32.totalorder %s1162_s17, %s1163_s18  ;;  %p1169_p13 = scmp.lt.s32.totalorder %s1167_s6, %s1163_s18 }
 0x14a   : > { %p1165_p9 = pnand %p1164_p5, %p1415_p11  ;;  %p1170_p0 = por %p1169_p13, %p1168_p12 }
 0x14c   : > { %p1166_p10 = pneg %p1165_p9 }
 0x14e   : > { %p1171_p2 = pnand %p1170_p0, %p1166_p10 }
 0x150   : > { %1174 = shalt.err (!%p1171_p2)
}
 0x151   : > { %s1278_s16 = smov 128   ;;  %s1279_s12 = smov 8  }
 0x152   : > { %984 = dma.vmem_to_hbm [thread:$0]  (%p1415_p11), %s726_s15, 2048, %s728_s14, %s712_s13, %s1278_s16, %s1278_s16, %s1279_s12  }
 0x153 PF: > { %p997_p4 = scmp.ge.s32.totalorder %s1271_s9, 2  ;;  %s742_s10 = sand.u32 1, %s1231_s26  }
 0x154   : > { %s743_s23 = scalar_lea.sflag [#allocation7], %s742_s10 }
 0x155   : > { %p993_p3 = pnand %p997_p4, %p1423_p1 }
 0x157   : > { %p994_p7 = pneg %p993_p3 }
 0x159   : > { %1226 = dma.done.wait (%p994_p7), %s743_s23, 2048  }
 0x15a   : > { %1228 = vsyncadd (%p994_p7), %s743_s23, 4294965248  ;;  %s34_s9 = sadd.s32 1, %s1271_s9   ;;  %s1682_s29 = sld [smem:[#allocation19_spill]] }
 0x15b   : > { %p31_p6 = scmp.ge.s32.totalorder %s34_s9, 6   ;;  %s1683_s21 = sld [smem:[#allocation14_spill]] }
 0x15c   : > { %s1684_s30 = sld [smem:[#allocation20_spill]]  ;;  %s1689_s26 = smov %s1235_s0 }
 0x15d   : > { %s1685_s19 = sld [smem:[#allocation15_spill]]  ;;  %s1690_s0 = smov %s1239_s27 }
 0x15e   : > { %s1686_s6 = sld [smem:[#allocation16_spill]]  ;;  %s1692_s1 = smov %s1247_s28 }
 0x15f   : > { %s1687_s7 = sld [smem:[#allocation17_spill]]  ;;  %33 = sbr.rel (!%p31_p6) target bundleno = 16 (0x10), region = 91 }
 0x160   : > { %s1688_s8 = sld [smem:[#allocation18_spill]]  ;;  %s1691_s27 = smov %s1682_s29 }
 0x161   : > { %s1693_s28 = smov %s1683_s21 }
 0x162   : > { %s1694_s29 = smov %s1684_s30 }
 0x163   : > { %s1695_s30 = smov %s1685_s19 }
 0x164   :  { %749 = vsyncpa [#allocation6], 1 }
 0x165   :  { %751 = vsyncpa [#allocation6 + $0x1], 1 }
 0x166   :  { %752 = vsyncpa [#allocation7], 1 }
 0x167   :  { %754 = vsyncpa [#allocation7 + $0x1], 1 }

</bundles_post_ra>
